<compile_context>
chip_gen: v7x
topology: tpu7x:2x2x1
jax: 0.10.0
libtpu: 0.0.40
codegen_flags: <defaults>
</compile_context>

<pallas_src>
import numpy as np
import jax
import jax.numpy as jnp
from jax.experimental import pallas as pl
from jax.experimental.pallas import tpu as pltpu


# ---------------------------------------------------------------------------
# Kernel
# ---------------------------------------------------------------------------
def make_actor_kernel(T, H, S, Bp, width, off):
    """Build the kernel with all dims / slab row-offsets baked in statically."""
    XROWS = T * Bp
    R_IH, R_HH, R_MSG = off["ih"], off["hh"], off["msg"]
    R_W1S, R_W2, R_W3, R_B = off["w1s"], off["w2"], off["w3"], off["bias"]

    def actor_kernel(d_ref, w_ref, out_ref):
        # ---- one-time slab slicing (static, 8-aligned row offsets) ----
        act = d_ref[XROWS:XROWS + Bp, :]                     # (Bp, 128)
        h = act[:, 0:H]
        c = act[:, H:2 * H]
        state = act[:, 2 * H:2 * H + S]

        # ---- hoisted input projection: ONE MXU op covers all T steps; the
        #      summed LSTM bias (b_ih + b_hh) is folded in. ----
        xg = (jnp.dot(d_ref[0:XROWS, :], w_ref[R_IH:R_IH + width, :],
                      preferred_element_type=jnp.float32)
              + w_ref[R_B:R_B + 1, :])                       # (T*Bp, 4H)

        whh = w_ref[R_HH:R_HH + H, :]                        # (H, 4H)

        # ---- fc1 running accumulator: state columns + fused fc1/Lstm.fc bias
        acc = (jnp.dot(state, w_ref[R_W1S:R_W1S + S, :],
                       preferred_element_type=jnp.float32)
               + w_ref[R_B + 1:R_B + 2, :])                  # (Bp, 128)

        # ---- LSTM recurrence, fully unrolled (static T). Per step: one MXU
        #      push (h @ W_hh), two whole-vreg EUP activations + tanh(c), and
        #      the fused message->fc1 accumulation riding the idle MXU slot.
        #      xg slices start at sublane-tile boundaries (Bp = 8). ----
        for t in range(T):
            gates = xg[t * Bp:(t + 1) * Bp, :] + jnp.dot(
                h, whh, preferred_element_type=jnp.float32)  # (Bp, 4H)
            sig = jax.nn.sigmoid(gates)                       # whole vreg
            tnh = jnp.tanh(gates)                             # whole vreg
            i_g = sig[:, 0:H]
            f_g = sig[:, H:2 * H]
            o_g = sig[:, 3 * H:4 * H]
            g_g = tnh[:, 2 * H:3 * H]
            c = f_g * c + i_g * g_g
            h = o_g * jnp.tanh(c)
            acc = acc + jnp.dot(h, w_ref[R_MSG + t * H:R_MSG + (t + 1) * H, :],
                                preferred_element_type=jnp.float32)

        # ---- MLP head ----
        h1 = jnp.maximum(acc, 0.0)
        h2 = jnp.maximum(
            jnp.dot(h1, w_ref[R_W2:R_W2 + width, :],
                    preferred_element_type=jnp.float32)
            + w_ref[R_B + 2:R_B + 3, :], 0.0)
        logits = (jnp.dot(h2, w_ref[R_W3:R_W3 + width, :],
                          preferred_element_type=jnp.float32)
                  + w_ref[R_B + 3:R_B + 4, :])               # (Bp, 128)

        # action_head padding lanes carry bias -1e30, so the full-128-lane
        # numerically-stable softmax is exact for the real lanes (pad -> 0).
        z = logits - jnp.max(logits, axis=1, keepdims=True)
        e = jnp.exp(z)
        prob = e / jnp.sum(e, axis=1, keepdims=True)

        # ---- single lane-dense output store: [prob | h | c | zero pad] ----
        out_ref[...] = jnp.concatenate(
            [prob, h, c, jnp.zeros((Bp, width - 2 * H), jnp.float32)], axis=1)

    return actor_kernel


# ---------------------------------------------------------------------------
# One-time parameter packing (fusion + slab layout)
# ---------------------------------------------------------------------------
def pack_params(p):
    """Fuse and pack the module weights into a single 128-lane weight slab.

    * b_ih + b_hh folded into one LSTM bias row.
    * Lstm.fc (H -> 1) fused algebraically into fc1's message columns:
        W_msg[t*H + j, :] = wlfc[j] * W1_msg[t, :]
        b1_eff            = b1 + blfc * sum_t W1_msg[t, :]
    * action_head padded to 128 output lanes; its bias padding lanes are set
      to -1e30 so the in-kernel softmax over 128 lanes stays exact.
    * All blocks stacked along sublanes at 8-aligned row offsets.
    """
    in_dim, H4 = p["wih_t"].shape
    H = p["whh_t"].shape[0]
    T = p["w1m_t"].shape[0]
    S = p["w1s_t"].shape[0]
    width = p["w1m_t"].shape[1]          # 128 (fc1/fc2 width)
    n_out = p["w3_t"].shape[1]
    assert H4 == width, "layout assumes 4*H == 128 == MLP width"

    w_msg = (p["w1m_t"][:, None, :] * p["wlfc_t"][None, :, 0:1]).reshape(T * H, width)
    b1_eff = p["b1"] + p["blfc"][0, 0] * jnp.sum(p["w1m_t"], axis=0, keepdims=True)

    wih_pad = jnp.zeros((width, width), jnp.float32).at[:in_dim, :].set(p["wih_t"])
    w3_pad = jnp.zeros((width, width), jnp.float32).at[:, :n_out].set(p["w3_t"])
    b3_pad = jnp.full((1, width), -1e30, jnp.float32).at[:, :n_out].set(p["b3"])
    bias_blk = jnp.concatenate(
        [p["bih"] + p["bhh"], b1_eff, p["b2"], b3_pad], axis=0)     # (4, 128)

    blocks = [("ih", wih_pad), ("hh", p["whh_t"]), ("msg", w_msg),
              ("w1s", p["w1s_t"]), ("w2", p["w2_t"]), ("w3", w3_pad),
              ("bias", bias_blk)]
    off, rows, cursor = {}, [], 0
    for name, blk in blocks:
        off[name] = cursor
        rows.append(blk.astype(jnp.float32))
        cursor += blk.shape[0]
    w_slab = jnp.concatenate(rows, axis=0)                           # (692, 128)

    return {"w_slab": w_slab, "off": off,
            "dims": dict(T=T, H=H, S=S, in_dim=in_dim, n_out=n_out, width=width)}


# ---------------------------------------------------------------------------
# Wrapper
# ---------------------------------------------------------------------------
def actor_forward(state, old_s_a, h_state, c_state, q):
    """state: (B,S); old_s_a: (B,T,in_dim); h_state/c_state: (1,B,H);
    q: packed params from pack_params()."""
    B, T, in_dim = old_s_a.shape
    H = h_state.shape[-1]
    d = q["dims"]
    S, n_out, width = d["S"], d["n_out"], d["width"]
    Bp = max(8, ((B + 7) // 8) * 8)      # batch padded to a sublane tile

    # data slab: time-major x, each step padded to Bp sublanes (rows t*Bp + b),
    # then h0 | c0 | state lane-concatenated into the final Bp rows.
    x_tm = jnp.transpose(old_s_a, (1, 0, 2)).astype(jnp.float32)     # (T, B, in)
    xblk = (jnp.zeros((T, Bp, width), jnp.float32)
            .at[:, :B, :in_dim].set(x_tm)
            .reshape(T * Bp, width))
    actblk = (jnp.zeros((Bp, width), jnp.float32)
              .at[:B, 0:H].set(h_state[0])
              .at[:B, H:2 * H].set(c_state[0])
              .at[:B, 2 * H:2 * H + S].set(state))
    data = jnp.concatenate([xblk, actblk], axis=0)                   # (T*Bp+Bp, 128)

    kernel = make_actor_kernel(T, H, S, Bp, width, q["off"])
    vmem = pl.BlockSpec(memory_space=pltpu.MemorySpace.VMEM)
    # NOTE: for large batches add grid=(B//Bt,) over batch chunks with
    # dimension_semantics=("parallel",) (v7x dual TensorCores); at B=2 the
    # no-grid form avoids per-grid-step overhead.
    out = pl.pallas_call(
        kernel,
        out_shape=jax.ShapeDtypeStruct((Bp, 2 * width), jnp.float32),
        in_specs=[vmem, vmem],
        out_specs=vmem,
    )(data, q["w_slab"])

    prob = out[:B, 0:n_out]
    h_fin = out[:B, width:width + H]
    c_fin = out[:B, width + H:width + 2 * H]
    # back to the PyTorch (num_layers=1, B, H) hidden-state layout
    return prob, h_fin[None], c_fin[None]


# ---------------------------------------------------------------------------
# Pure-JAX reference mirroring the PyTorch semantics (unfused weights)
# ---------------------------------------------------------------------------
def reference_forward(state, old_s_a, h_state, c_state, p):
    B, T, _ = old_s_a.shape
    H = h_state.shape[-1]
    h, c = h_state[0], c_state[0]
    msgs = []
    for t in range(T):
        x_t = old_s_a[:, t, :]
        gates = x_t @ p["wih_t"] + h @ p["whh_t"] + p["bih"] + p["bhh"]
        i_g = jax.nn.sigmoid(gates[:, 0:H])
        f_g = jax.nn.sigmoid(gates[:, H:2 * H])
        g_g = jnp.tanh(gates[:, 2 * H:3 * H])
        o_g = jax.nn.sigmoid(gates[:, 3 * H:4 * H])
        c = f_g * c + i_g * g_g
        h = o_g * jnp.tanh(c)
        msgs.append(h @ p["wlfc_t"] + p["blfc"])                     # (B, 1)
    message = jnp.concatenate(msgs, axis=1)                          # (B, T)
    m_s = jnp.concatenate([message, state], axis=1)                  # (B, T+S)
    w1_t = jnp.concatenate([p["w1m_t"], p["w1s_t"]], axis=0)
    h1 = jax.nn.relu(m_s @ w1_t + p["b1"])
    h2 = jax.nn.relu(h1 @ p["w2_t"] + p["b2"])
    logits = h2 @ p["w3_t"] + p["b3"]
    return jax.nn.softmax(logits, axis=1), h[None], c[None]


def init_params(key, in_dim, H, T, S, n_out):
    """Deterministic synthetic params (PyTorch-style uniform fan-in scaling)."""
    ks = jax.random.split(key, 12)

    def u(k, shape, fan_in):
        s = 1.0 / np.sqrt(fan_in)
        return jax.random.uniform(k, shape, jnp.float32, -s, s)

    mlp_in = T + S  # ppo_network_input_dim
    w1_t = u(ks[6], (mlp_in, 128), mlp_in)
    return {
        # LSTM weights (pre-transposed to (in, out)); gate order [i, f, g, o]
        "wih_t": u(ks[0], (in_dim, 4 * H), H),
        "whh_t": u(ks[1], (H, 4 * H), H),
        "bih":   u(ks[2], (1, 4 * H), H),
        "bhh":   u(ks[3], (1, 4 * H), H),
        # Lstm.fc : H -> 1
        "wlfc_t": u(ks[4], (H, 1), H),
        "blfc":   u(ks[5], (1, 1), H),
        # Actor.fc1 : (T+S) -> 128, split into message / state halves
        "w1m_t": w1_t[:T],
        "w1s_t": w1_t[T:],
        "b1":    u(ks[7], (1, 128), mlp_in),
        # Actor.fc2 : 128 -> 128
        "w2_t": u(ks[8], (128, 128), 128),
        "b2":   u(ks[9], (1, 128), 128),
        # Actor.action_head : 128 -> n_out
        "w3_t": u(ks[10], (128, n_out), 128),
        "b3":   u(ks[11], (1, n_out), 128),
    }


if __name__ == "__main__":
    B, T, IN_DIM, H = 2, 8, 4, 32
    S, N_OUT = 16, 6

    key = jax.random.PRNGKey(0)
    k_state, k_seq, k_h, k_c, k_par = jax.random.split(key, 5)

    state = jax.random.normal(k_state, (B, S), jnp.float32)
    old_s_a = jax.random.normal(k_seq, (B, T, IN_DIM), jnp.float32)
    h_state = jax.random.normal(k_h, (1, B, H), jnp.float32)   # num_layers = 1
    c_state = jax.random.normal(k_c, (1, B, H), jnp.float32)
    params = init_params(k_par, IN_DIM, H, T, S, N_OUT)
    packed = pack_params(params)                               # one-time packing

    prob, h_, c_ = actor_forward(state, old_s_a, h_state, c_state, packed)
    jax.block_until_ready((prob, h_, c_))

    prob_r, h_r, c_r = reference_forward(state, old_s_a, h_state, c_state, params)
    np.testing.assert_allclose(np.asarray(prob), np.asarray(prob_r),
                               rtol=1e-4, atol=1e-5)
    np.testing.assert_allclose(np.asarray(h_), np.asarray(h_r), rtol=1e-5, atol=1e-5)
    np.testing.assert_allclose(np.asarray(c_), np.asarray(c_r), rtol=1e-5, atol=1e-5)
    assert bool(jnp.allclose(jnp.sum(prob, axis=1), 1.0, atol=1e-5))

    print("KERNEL_OK")
</pallas_src>

<mosaic_0001>
module attributes {stable_mosaic.version = 11 : i64} {
  func.func @actor_kernel(%arg0: memref<72x128xf32, #tpu.memory_space<vmem>>, %arg1: memref<692x128xf32, #tpu.memory_space<vmem>>, %arg2: memref<8x256xf32, #tpu.memory_space<vmem>>) attributes {dimension_semantics = [], scalar_prefetch = 0 : i64, scratch_operands = 0 : i64, tpu.core_type = #tpu.core_type<tc>} {
    %c64 = arith.constant 64 : index
    %c0 = arith.constant 0 : index
    %0 = vector.load %arg0[%c64, %c0] : memref<72x128xf32, #tpu.memory_space<vmem>>, vector<8x128xf32>
    %1 = vector.extract_strided_slice %0 {offsets = [0, 0], sizes = [8, 32], strides = [1, 1]} : vector<8x128xf32> to vector<8x32xf32>
    %2 = vector.extract_strided_slice %0 {offsets = [0, 32], sizes = [8, 32], strides = [1, 1]} : vector<8x128xf32> to vector<8x32xf32>
    %3 = vector.extract_strided_slice %0 {offsets = [0, 64], sizes = [8, 16], strides = [1, 1]} : vector<8x128xf32> to vector<8x16xf32>
    %c0_0 = arith.constant 0 : index
    %c0_1 = arith.constant 0 : index
    %4 = vector.load %arg0[%c0_0, %c0_1] : memref<72x128xf32, #tpu.memory_space<vmem>>, vector<64x128xf32>
    %c0_2 = arith.constant 0 : index
    %c0_3 = arith.constant 0 : index
    %5 = vector.load %arg1[%c0_2, %c0_3] : memref<692x128xf32, #tpu.memory_space<vmem>>, vector<128x128xf32>
    %cst = arith.constant dense<0.000000e+00> : vector<64x128xf32>
    %6 = tpu.matmul %4, %5, %cst {dimension_numbers = #tpu.dot_dimension_numbers<[1], [0], [0], [1], [0, 0, 1, 1], [], []>} : vector<64x128xf32>, vector<128x128xf32>, vector<64x128xf32> -> vector<64x128xf32>
    %c688 = arith.constant 688 : index
    %c0_4 = arith.constant 0 : index
    %7 = vector.load %arg1[%c688, %c0_4] : memref<692x128xf32, #tpu.memory_space<vmem>>, vector<1x128xf32>
    %8 = vector.broadcast %7 : vector<1x128xf32> to vector<64x128xf32>
    %9 = arith.addf %6, %8 : vector<64x128xf32>
    %c128 = arith.constant 128 : index
    %c0_5 = arith.constant 0 : index
    %10 = vector.load %arg1[%c128, %c0_5] : memref<692x128xf32, #tpu.memory_space<vmem>>, vector<32x128xf32>
    %c416 = arith.constant 416 : index
    %c0_6 = arith.constant 0 : index
    %11 = vector.load %arg1[%c416, %c0_6] : memref<692x128xf32, #tpu.memory_space<vmem>>, vector<16x128xf32>
    %cst_7 = arith.constant dense<0.000000e+00> : vector<8x128xf32>
    %12 = tpu.matmul %3, %11, %cst_7 {dimension_numbers = #tpu.dot_dimension_numbers<[1], [0], [0], [1], [0, 0, 1, 1], [], []>} : vector<8x16xf32>, vector<16x128xf32>, vector<8x128xf32> -> vector<8x128xf32>
    %c689 = arith.constant 689 : index
    %c0_8 = arith.constant 0 : index
    %13 = vector.load %arg1[%c689, %c0_8] : memref<692x128xf32, #tpu.memory_space<vmem>>, vector<1x128xf32>
    %14 = vector.broadcast %13 : vector<1x128xf32> to vector<8x128xf32>
    %15 = arith.addf %12, %14 : vector<8x128xf32>
    %16 = vector.extract_strided_slice %9 {offsets = [0, 0], sizes = [8, 128], strides = [1, 1]} : vector<64x128xf32> to vector<8x128xf32>
    %cst_9 = arith.constant dense<0.000000e+00> : vector<8x128xf32>
    %17 = tpu.matmul %1, %10, %cst_9 {dimension_numbers = #tpu.dot_dimension_numbers<[1], [0], [0], [1], [0, 0, 1, 1], [], []>} : vector<8x32xf32>, vector<32x128xf32>, vector<8x128xf32> -> vector<8x128xf32>
    %18 = arith.addf %16, %17 : vector<8x128xf32>
    %19 = arith.negf %18 : vector<8x128xf32>
    %20 = math.exp %19 : vector<8x128xf32>
    %cst_10 = arith.constant 1.000000e+00 : f32
    %21 = vector.broadcast %cst_10 : f32 to vector<8x128xf32>
    %22 = arith.addf %21, %20 : vector<8x128xf32>
    %23 = arith.divf %21, %22 : vector<8x128xf32>
    %24 = math.tanh %18 : vector<8x128xf32>
    %25 = vector.extract_strided_slice %23 {offsets = [0, 0], sizes = [8, 32], strides = [1, 1]} : vector<8x128xf32> to vector<8x32xf32>
    %26 = vector.extract_strided_slice %23 {offsets = [0, 32], sizes = [8, 32], strides = [1, 1]} : vector<8x128xf32> to vector<8x32xf32>
    %27 = vector.extract_strided_slice %23 {offsets = [0, 96], sizes = [8, 32], strides = [1, 1]} : vector<8x128xf32> to vector<8x32xf32>
    %28 = vector.extract_strided_slice %24 {offsets = [0, 64], sizes = [8, 32], strides = [1, 1]} : vector<8x128xf32> to vector<8x32xf32>
    %29 = arith.mulf %26, %2 : vector<8x32xf32>
    %30 = arith.mulf %25, %28 : vector<8x32xf32>
    %31 = arith.addf %29, %30 : vector<8x32xf32>
    %32 = math.tanh %31 : vector<8x32xf32>
    %33 = arith.mulf %27, %32 : vector<8x32xf32>
    %c160 = arith.constant 160 : index
    %c0_11 = arith.constant 0 : index
    %34 = vector.load %arg1[%c160, %c0_11] : memref<692x128xf32, #tpu.memory_space<vmem>>, vector<32x128xf32>
    %cst_12 = arith.constant dense<0.000000e+00> : vector<8x128xf32>
    %35 = tpu.matmul %33, %34, %cst_12 {dimension_numbers = #tpu.dot_dimension_numbers<[1], [0], [0], [1], [0, 0, 1, 1], [], []>} : vector<8x32xf32>, vector<32x128xf32>, vector<8x128xf32> -> vector<8x128xf32>
    %36 = arith.addf %15, %35 : vector<8x128xf32>
    %37 = vector.extract_strided_slice %9 {offsets = [8, 0], sizes = [8, 128], strides = [1, 1]} : vector<64x128xf32> to vector<8x128xf32>
    %cst_13 = arith.constant dense<0.000000e+00> : vector<8x128xf32>
    %38 = tpu.matmul %33, %10, %cst_13 {dimension_numbers = #tpu.dot_dimension_numbers<[1], [0], [0], [1], [0, 0, 1, 1], [], []>} : vector<8x32xf32>, vector<32x128xf32>, vector<8x128xf32> -> vector<8x128xf32>
    %39 = arith.addf %37, %38 : vector<8x128xf32>
    %40 = arith.negf %39 : vector<8x128xf32>
    %41 = math.exp %40 : vector<8x128xf32>
    %cst_14 = arith.constant 1.000000e+00 : f32
    %42 = vector.broadcast %cst_14 : f32 to vector<8x128xf32>
    %43 = arith.addf %42, %41 : vector<8x128xf32>
    %44 = arith.divf %42, %43 : vector<8x128xf32>
    %45 = math.tanh %39 : vector<8x128xf32>
    %46 = vector.extract_strided_slice %44 {offsets = [0, 0], sizes = [8, 32], strides = [1, 1]} : vector<8x128xf32> to vector<8x32xf32>
    %47 = vector.extract_strided_slice %44 {offsets = [0, 32], sizes = [8, 32], strides = [1, 1]} : vector<8x128xf32> to vector<8x32xf32>
    %48 = vector.extract_strided_slice %44 {offsets = [0, 96], sizes = [8, 32], strides = [1, 1]} : vector<8x128xf32> to vector<8x32xf32>
    %49 = vector.extract_strided_slice %45 {offsets = [0, 64], sizes = [8, 32], strides = [1, 1]} : vector<8x128xf32> to vector<8x32xf32>
    %50 = arith.mulf %47, %31 : vector<8x32xf32>
    %51 = arith.mulf %46, %49 : vector<8x32xf32>
    %52 = arith.addf %50, %51 : vector<8x32xf32>
    %53 = math.tanh %52 : vector<8x32xf32>
    %54 = arith.mulf %48, %53 : vector<8x32xf32>
    %c192 = arith.constant 192 : index
    %c0_15 = arith.constant 0 : index
    %55 = vector.load %arg1[%c192, %c0_15] : memref<692x128xf32, #tpu.memory_space<vmem>>, vector<32x128xf32>
    %cst_16 = arith.constant dense<0.000000e+00> : vector<8x128xf32>
    %56 = tpu.matmul %54, %55, %cst_16 {dimension_numbers = #tpu.dot_dimension_numbers<[1], [0], [0], [1], [0, 0, 1, 1], [], []>} : vector<8x32xf32>, vector<32x128xf32>, vector<8x128xf32> -> vector<8x128xf32>
    %57 = arith.addf %36, %56 : vector<8x128xf32>
    %58 = vector.extract_strided_slice %9 {offsets = [16, 0], sizes = [8, 128], strides = [1, 1]} : vector<64x128xf32> to vector<8x128xf32>
    %cst_17 = arith.constant dense<0.000000e+00> : vector<8x128xf32>
    %59 = tpu.matmul %54, %10, %cst_17 {dimension_numbers = #tpu.dot_dimension_numbers<[1], [0], [0], [1], [0, 0, 1, 1], [], []>} : vector<8x32xf32>, vector<32x128xf32>, vector<8x128xf32> -> vector<8x128xf32>
    %60 = arith.addf %58, %59 : vector<8x128xf32>
    %61 = arith.negf %60 : vector<8x128xf32>
    %62 = math.exp %61 : vector<8x128xf32>
    %cst_18 = arith.constant 1.000000e+00 : f32
    %63 = vector.broadcast %cst_18 : f32 to vector<8x128xf32>
    %64 = arith.addf %63, %62 : vector<8x128xf32>
    %65 = arith.divf %63, %64 : vector<8x128xf32>
    %66 = math.tanh %60 : vector<8x128xf32>
    %67 = vector.extract_strided_slice %65 {offsets = [0, 0], sizes = [8, 32], strides = [1, 1]} : vector<8x128xf32> to vector<8x32xf32>
    %68 = vector.extract_strided_slice %65 {offsets = [0, 32], sizes = [8, 32], strides = [1, 1]} : vector<8x128xf32> to vector<8x32xf32>
    %69 = vector.extract_strided_slice %65 {offsets = [0, 96], sizes = [8, 32], strides = [1, 1]} : vector<8x128xf32> to vector<8x32xf32>
    %70 = vector.extract_strided_slice %66 {offsets = [0, 64], sizes = [8, 32], strides = [1, 1]} : vector<8x128xf32> to vector<8x32xf32>
    %71 = arith.mulf %68, %52 : vector<8x32xf32>
    %72 = arith.mulf %67, %70 : vector<8x32xf32>
    %73 = arith.addf %71, %72 : vector<8x32xf32>
    %74 = math.tanh %73 : vector<8x32xf32>
    %75 = arith.mulf %69, %74 : vector<8x32xf32>
    %c224 = arith.constant 224 : index
    %c0_19 = arith.constant 0 : index
    %76 = vector.load %arg1[%c224, %c0_19] : memref<692x128xf32, #tpu.memory_space<vmem>>, vector<32x128xf32>
    %cst_20 = arith.constant dense<0.000000e+00> : vector<8x128xf32>
    %77 = tpu.matmul %75, %76, %cst_20 {dimension_numbers = #tpu.dot_dimension_numbers<[1], [0], [0], [1], [0, 0, 1, 1], [], []>} : vector<8x32xf32>, vector<32x128xf32>, vector<8x128xf32> -> vector<8x128xf32>
    %78 = arith.addf %57, %77 : vector<8x128xf32>
    %79 = vector.extract_strided_slice %9 {offsets = [24, 0], sizes = [8, 128], strides = [1, 1]} : vector<64x128xf32> to vector<8x128xf32>
    %cst_21 = arith.constant dense<0.000000e+00> : vector<8x128xf32>
    %80 = tpu.matmul %75, %10, %cst_21 {dimension_numbers = #tpu.dot_dimension_numbers<[1], [0], [0], [1], [0, 0, 1, 1], [], []>} : vector<8x32xf32>, vector<32x128xf32>, vector<8x128xf32> -> vector<8x128xf32>
    %81 = arith.addf %79, %80 : vector<8x128xf32>
    %82 = arith.negf %81 : vector<8x128xf32>
    %83 = math.exp %82 : vector<8x128xf32>
    %cst_22 = arith.constant 1.000000e+00 : f32
    %84 = vector.broadcast %cst_22 : f32 to vector<8x128xf32>
    %85 = arith.addf %84, %83 : vector<8x128xf32>
    %86 = arith.divf %84, %85 : vector<8x128xf32>
    %87 = math.tanh %81 : vector<8x128xf32>
    %88 = vector.extract_strided_slice %86 {offsets = [0, 0], sizes = [8, 32], strides = [1, 1]} : vector<8x128xf32> to vector<8x32xf32>
    %89 = vector.extract_strided_slice %86 {offsets = [0, 32], sizes = [8, 32], strides = [1, 1]} : vector<8x128xf32> to vector<8x32xf32>
    %90 = vector.extract_strided_slice %86 {offsets = [0, 96], sizes = [8, 32], strides = [1, 1]} : vector<8x128xf32> to vector<8x32xf32>
    %91 = vector.extract_strided_slice %87 {offsets = [0, 64], sizes = [8, 32], strides = [1, 1]} : vector<8x128xf32> to vector<8x32xf32>
    %92 = arith.mulf %89, %73 : vector<8x32xf32>
    %93 = arith.mulf %88, %91 : vector<8x32xf32>
    %94 = arith.addf %92, %93 : vector<8x32xf32>
    %95 = math.tanh %94 : vector<8x32xf32>
    %96 = arith.mulf %90, %95 : vector<8x32xf32>
    %c256 = arith.constant 256 : index
    %c0_23 = arith.constant 0 : index
    %97 = vector.load %arg1[%c256, %c0_23] : memref<692x128xf32, #tpu.memory_space<vmem>>, vector<32x128xf32>
    %cst_24 = arith.constant dense<0.000000e+00> : vector<8x128xf32>
    %98 = tpu.matmul %96, %97, %cst_24 {dimension_numbers = #tpu.dot_dimension_numbers<[1], [0], [0], [1], [0, 0, 1, 1], [], []>} : vector<8x32xf32>, vector<32x128xf32>, vector<8x128xf32> -> vector<8x128xf32>
    %99 = arith.addf %78, %98 : vector<8x128xf32>
    %100 = vector.extract_strided_slice %9 {offsets = [32, 0], sizes = [8, 128], strides = [1, 1]} : vector<64x128xf32> to vector<8x128xf32>
    %cst_25 = arith.constant dense<0.000000e+00> : vector<8x128xf32>
    %101 = tpu.matmul %96, %10, %cst_25 {dimension_numbers = #tpu.dot_dimension_numbers<[1], [0], [0], [1], [0, 0, 1, 1], [], []>} : vector<8x32xf32>, vector<32x128xf32>, vector<8x128xf32> -> vector<8x128xf32>
    %102 = arith.addf %100, %101 : vector<8x128xf32>
    %103 = arith.negf %102 : vector<8x128xf32>
    %104 = math.exp %103 : vector<8x128xf32>
    %cst_26 = arith.constant 1.000000e+00 : f32
    %105 = vector.broadcast %cst_26 : f32 to vector<8x128xf32>
    %106 = arith.addf %105, %104 : vector<8x128xf32>
    %107 = arith.divf %105, %106 : vector<8x128xf32>
    %108 = math.tanh %102 : vector<8x128xf32>
    %109 = vector.extract_strided_slice %107 {offsets = [0, 0], sizes = [8, 32], strides = [1, 1]} : vector<8x128xf32> to vector<8x32xf32>
    %110 = vector.extract_strided_slice %107 {offsets = [0, 32], sizes = [8, 32], strides = [1, 1]} : vector<8x128xf32> to vector<8x32xf32>
    %111 = vector.extract_strided_slice %107 {offsets = [0, 96], sizes = [8, 32], strides = [1, 1]} : vector<8x128xf32> to vector<8x32xf32>
    %112 = vector.extract_strided_slice %108 {offsets = [0, 64], sizes = [8, 32], strides = [1, 1]} : vector<8x128xf32> to vector<8x32xf32>
    %113 = arith.mulf %110, %94 : vector<8x32xf32>
    %114 = arith.mulf %109, %112 : vector<8x32xf32>
    %115 = arith.addf %113, %114 : vector<8x32xf32>
    %116 = math.tanh %115 : vector<8x32xf32>
    %117 = arith.mulf %111, %116 : vector<8x32xf32>
    %c288 = arith.constant 288 : index
    %c0_27 = arith.constant 0 : index
    %118 = vector.load %arg1[%c288, %c0_27] : memref<692x128xf32, #tpu.memory_space<vmem>>, vector<32x128xf32>
    %cst_28 = arith.constant dense<0.000000e+00> : vector<8x128xf32>
    %119 = tpu.matmul %117, %118, %cst_28 {dimension_numbers = #tpu.dot_dimension_numbers<[1], [0], [0], [1], [0, 0, 1, 1], [], []>} : vector<8x32xf32>, vector<32x128xf32>, vector<8x128xf32> -> vector<8x128xf32>
    %120 = arith.addf %99, %119 : vector<8x128xf32>
    %121 = vector.extract_strided_slice %9 {offsets = [40, 0], sizes = [8, 128], strides = [1, 1]} : vector<64x128xf32> to vector<8x128xf32>
    %cst_29 = arith.constant dense<0.000000e+00> : vector<8x128xf32>
    %122 = tpu.matmul %117, %10, %cst_29 {dimension_numbers = #tpu.dot_dimension_numbers<[1], [0], [0], [1], [0, 0, 1, 1], [], []>} : vector<8x32xf32>, vector<32x128xf32>, vector<8x128xf32> -> vector<8x128xf32>
    %123 = arith.addf %121, %122 : vector<8x128xf32>
    %124 = arith.negf %123 : vector<8x128xf32>
    %125 = math.exp %124 : vector<8x128xf32>
    %cst_30 = arith.constant 1.000000e+00 : f32
    %126 = vector.broadcast %cst_30 : f32 to vector<8x128xf32>
    %127 = arith.addf %126, %125 : vector<8x128xf32>
    %128 = arith.divf %126, %127 : vector<8x128xf32>
    %129 = math.tanh %123 : vector<8x128xf32>
    %130 = vector.extract_strided_slice %128 {offsets = [0, 0], sizes = [8, 32], strides = [1, 1]} : vector<8x128xf32> to vector<8x32xf32>
    %131 = vector.extract_strided_slice %128 {offsets = [0, 32], sizes = [8, 32], strides = [1, 1]} : vector<8x128xf32> to vector<8x32xf32>
    %132 = vector.extract_strided_slice %128 {offsets = [0, 96], sizes = [8, 32], strides = [1, 1]} : vector<8x128xf32> to vector<8x32xf32>
    %133 = vector.extract_strided_slice %129 {offsets = [0, 64], sizes = [8, 32], strides = [1, 1]} : vector<8x128xf32> to vector<8x32xf32>
    %134 = arith.mulf %131, %115 : vector<8x32xf32>
    %135 = arith.mulf %130, %133 : vector<8x32xf32>
    %136 = arith.addf %134, %135 : vector<8x32xf32>
    %137 = math.tanh %136 : vector<8x32xf32>
    %138 = arith.mulf %132, %137 : vector<8x32xf32>
    %c320 = arith.constant 320 : index
    %c0_31 = arith.constant 0 : index
    %139 = vector.load %arg1[%c320, %c0_31] : memref<692x128xf32, #tpu.memory_space<vmem>>, vector<32x128xf32>
    %cst_32 = arith.constant dense<0.000000e+00> : vector<8x128xf32>
    %140 = tpu.matmul %138, %139, %cst_32 {dimension_numbers = #tpu.dot_dimension_numbers<[1], [0], [0], [1], [0, 0, 1, 1], [], []>} : vector<8x32xf32>, vector<32x128xf32>, vector<8x128xf32> -> vector<8x128xf32>
    %141 = arith.addf %120, %140 : vector<8x128xf32>
    %142 = vector.extract_strided_slice %9 {offsets = [48, 0], sizes = [8, 128], strides = [1, 1]} : vector<64x128xf32> to vector<8x128xf32>
    %cst_33 = arith.constant dense<0.000000e+00> : vector<8x128xf32>
    %143 = tpu.matmul %138, %10, %cst_33 {dimension_numbers = #tpu.dot_dimension_numbers<[1], [0], [0], [1], [0, 0, 1, 1], [], []>} : vector<8x32xf32>, vector<32x128xf32>, vector<8x128xf32> -> vector<8x128xf32>
    %144 = arith.addf %142, %143 : vector<8x128xf32>
    %145 = arith.negf %144 : vector<8x128xf32>
    %146 = math.exp %145 : vector<8x128xf32>
    %cst_34 = arith.constant 1.000000e+00 : f32
    %147 = vector.broadcast %cst_34 : f32 to vector<8x128xf32>
    %148 = arith.addf %147, %146 : vector<8x128xf32>
    %149 = arith.divf %147, %148 : vector<8x128xf32>
    %150 = math.tanh %144 : vector<8x128xf32>
    %151 = vector.extract_strided_slice %149 {offsets = [0, 0], sizes = [8, 32], strides = [1, 1]} : vector<8x128xf32> to vector<8x32xf32>
    %152 = vector.extract_strided_slice %149 {offsets = [0, 32], sizes = [8, 32], strides = [1, 1]} : vector<8x128xf32> to vector<8x32xf32>
    %153 = vector.extract_strided_slice %149 {offsets = [0, 96], sizes = [8, 32], strides = [1, 1]} : vector<8x128xf32> to vector<8x32xf32>
    %154 = vector.extract_strided_slice %150 {offsets = [0, 64], sizes = [8, 32], strides = [1, 1]} : vector<8x128xf32> to vector<8x32xf32>
    %155 = arith.mulf %152, %136 : vector<8x32xf32>
    %156 = arith.mulf %151, %154 : vector<8x32xf32>
    %157 = arith.addf %155, %156 : vector<8x32xf32>
    %158 = math.tanh %157 : vector<8x32xf32>
    %159 = arith.mulf %153, %158 : vector<8x32xf32>
    %c352 = arith.constant 352 : index
    %c0_35 = arith.constant 0 : index
    %160 = vector.load %arg1[%c352, %c0_35] : memref<692x128xf32, #tpu.memory_space<vmem>>, vector<32x128xf32>
    %cst_36 = arith.constant dense<0.000000e+00> : vector<8x128xf32>
    %161 = tpu.matmul %159, %160, %cst_36 {dimension_numbers = #tpu.dot_dimension_numbers<[1], [0], [0], [1], [0, 0, 1, 1], [], []>} : vector<8x32xf32>, vector<32x128xf32>, vector<8x128xf32> -> vector<8x128xf32>
    %162 = arith.addf %141, %161 : vector<8x128xf32>
    %163 = vector.extract_strided_slice %9 {offsets = [56, 0], sizes = [8, 128], strides = [1, 1]} : vector<64x128xf32> to vector<8x128xf32>
    %cst_37 = arith.constant dense<0.000000e+00> : vector<8x128xf32>
    %164 = tpu.matmul %159, %10, %cst_37 {dimension_numbers = #tpu.dot_dimension_numbers<[1], [0], [0], [1], [0, 0, 1, 1], [], []>} : vector<8x32xf32>, vector<32x128xf32>, vector<8x128xf32> -> vector<8x128xf32>
    %165 = arith.addf %163, %164 : vector<8x128xf32>
    %166 = arith.negf %165 : vector<8x128xf32>
    %167 = math.exp %166 : vector<8x128xf32>
    %cst_38 = arith.constant 1.000000e+00 : f32
    %168 = vector.broadcast %cst_38 : f32 to vector<8x128xf32>
    %169 = arith.addf %168, %167 : vector<8x128xf32>
    %170 = arith.divf %168, %169 : vector<8x128xf32>
    %171 = math.tanh %165 : vector<8x128xf32>
    %172 = vector.extract_strided_slice %170 {offsets = [0, 0], sizes = [8, 32], strides = [1, 1]} : vector<8x128xf32> to vector<8x32xf32>
    %173 = vector.extract_strided_slice %170 {offsets = [0, 32], sizes = [8, 32], strides = [1, 1]} : vector<8x128xf32> to vector<8x32xf32>
    %174 = vector.extract_strided_slice %170 {offsets = [0, 96], sizes = [8, 32], strides = [1, 1]} : vector<8x128xf32> to vector<8x32xf32>
    %175 = vector.extract_strided_slice %171 {offsets = [0, 64], sizes = [8, 32], strides = [1, 1]} : vector<8x128xf32> to vector<8x32xf32>
    %176 = arith.mulf %173, %157 : vector<8x32xf32>
    %177 = arith.mulf %172, %175 : vector<8x32xf32>
    %178 = arith.addf %176, %177 : vector<8x32xf32>
    %179 = math.tanh %178 : vector<8x32xf32>
    %180 = arith.mulf %174, %179 : vector<8x32xf32>
    %c384 = arith.constant 384 : index
    %c0_39 = arith.constant 0 : index
    %181 = vector.load %arg1[%c384, %c0_39] : memref<692x128xf32, #tpu.memory_space<vmem>>, vector<32x128xf32>
    %cst_40 = arith.constant dense<0.000000e+00> : vector<8x128xf32>
    %182 = tpu.matmul %180, %181, %cst_40 {dimension_numbers = #tpu.dot_dimension_numbers<[1], [0], [0], [1], [0, 0, 1, 1], [], []>} : vector<8x32xf32>, vector<32x128xf32>, vector<8x128xf32> -> vector<8x128xf32>
    %183 = arith.addf %162, %182 : vector<8x128xf32>
    %cst_41 = arith.constant 0.000000e+00 : f32
    %184 = vector.broadcast %cst_41 : f32 to vector<8x128xf32>
    %185 = arith.maximumf %183, %184 : vector<8x128xf32>
    %c432 = arith.constant 432 : index
    %c0_42 = arith.constant 0 : index
    %186 = vector.load %arg1[%c432, %c0_42] : memref<692x128xf32, #tpu.memory_space<vmem>>, vector<128x128xf32>
    %cst_43 = arith.constant dense<0.000000e+00> : vector<8x128xf32>
    %187 = tpu.matmul %185, %186, %cst_43 {dimension_numbers = #tpu.dot_dimension_numbers<[1], [0], [0], [1], [0, 0, 1, 1], [], []>} : vector<8x128xf32>, vector<128x128xf32>, vector<8x128xf32> -> vector<8x128xf32>
    %c690 = arith.constant 690 : index
    %c0_44 = arith.constant 0 : index
    %188 = vector.load %arg1[%c690, %c0_44] : memref<692x128xf32, #tpu.memory_space<vmem>>, vector<1x128xf32>
    %189 = vector.broadcast %188 : vector<1x128xf32> to vector<8x128xf32>
    %190 = arith.addf %187, %189 : vector<8x128xf32>
    %cst_45 = arith.constant 0.000000e+00 : f32
    %191 = vector.broadcast %cst_45 : f32 to vector<8x128xf32>
    %192 = arith.maximumf %190, %191 : vector<8x128xf32>
    %c560 = arith.constant 560 : index
    %c0_46 = arith.constant 0 : index
    %193 = vector.load %arg1[%c560, %c0_46] : memref<692x128xf32, #tpu.memory_space<vmem>>, vector<128x128xf32>
    %cst_47 = arith.constant dense<0.000000e+00> : vector<8x128xf32>
    %194 = tpu.matmul %192, %193, %cst_47 {dimension_numbers = #tpu.dot_dimension_numbers<[1], [0], [0], [1], [0, 0, 1, 1], [], []>} : vector<8x128xf32>, vector<128x128xf32>, vector<8x128xf32> -> vector<8x128xf32>
    %c691 = arith.constant 691 : index
    %c0_48 = arith.constant 0 : index
    %195 = vector.load %arg1[%c691, %c0_48] : memref<692x128xf32, #tpu.memory_space<vmem>>, vector<1x128xf32>
    %196 = vector.broadcast %195 : vector<1x128xf32> to vector<8x128xf32>
    %197 = arith.addf %194, %196 : vector<8x128xf32>
    %cst_49 = arith.constant dense<0xFF800000> : vector<8xf32>
    %198 = vector.multi_reduction <maximumf>, %197, %cst_49 [1] : vector<8x128xf32> to vector<8xf32>
    %199 = vector.shape_cast %198 : vector<8xf32> to vector<8x1xf32>
    %200 = vector.broadcast %199 : vector<8x1xf32> to vector<8x128xf32>
    %201 = arith.subf %197, %200 : vector<8x128xf32>
    %202 = math.exp %201 : vector<8x128xf32>
    %cst_50 = arith.constant dense<0.000000e+00> : vector<8xf32>
    %203 = vector.multi_reduction <add>, %202, %cst_50 [1] : vector<8x128xf32> to vector<8xf32>
    %204 = vector.shape_cast %203 : vector<8xf32> to vector<8x1xf32>
    %205 = vector.broadcast %204 : vector<8x1xf32> to vector<8x128xf32>
    %206 = arith.divf %202, %205 : vector<8x128xf32>
    %cst_51 = arith.constant 0.000000e+00 : f32
    %207 = vector.broadcast %cst_51 : f32 to vector<8x64xf32>
    %208 = tpu.concatenate %206, %180, %178, %207 in 1 : vector<8x128xf32>, vector<8x32xf32>, vector<8x32xf32>, vector<8x64xf32> -> vector<8x256xf32>
    %c0_52 = arith.constant 0 : index
    %c0_53 = arith.constant 0 : index
    %209 = vector.load %arg2[%c0_52, %c0_53] : memref<8x256xf32, #tpu.memory_space<vmem>>, vector<8x256xf32>
    tpu.vector_store %arg2[%c0_52, %c0_53], %208 {strides = array<i32>} : memref<8x256xf32, #tpu.memory_space<vmem>>, vector<8x256xf32>,
    return
  }
}

</mosaic_0001>

<bundles_post_ra>
// kernel: tpu_custom_call.1
= control target key start
LH: loop header
LB: loop body
LE: loop exit
PB: predicated region body
PF: predicated region fallthrough
CT: control target
= control target key end

     0   :  { %7 = vsyncpa [#allocation3], 0  ;;  %s2944_s0 = inlined_call_operand.hbm [shape: f32[72,128], index: 0, kind: input, shape index: {}]   ;;  %s2945_s1 = inlined_call_operand.hbm [shape: f32[692,128], index: 1, kind: input, shape index: {}]   ;;  %s2946_s2 = inlined_call_operand.hbm [shape: f32[8,256], index: 2, kind: output, shape index: {}]  }
   0x1   :  { %8 = vsyncpa [#allocation6], 0 }
   0x2   :  { %9 = vsyncpa [#allocation4], 0  ;;  %s2692_s9 = smov [#allocation2]   ;;  %s2620_s13 = scalar_lea.hbm %s2944_s0, 1152 }
   0x3   :  { %s15_s10 = sshll.u32 %s2692_s9, 4  ;;  %p2621_p0 = scmp.ne.s32.totalorder %s2944_s0, %s2620_s13  ;;  %s16_s10 = int_to_ptr.vmem [resolvable:$true] %s15_s10 }
   0x4   :  { %p2624_p1 = scmp.lt.u32.totalorder %s2620_s13, %s2944_s0 }
   0x6   :  { %p2626_p2 = pnand %p2624_p1, %p2621_p0 }
   0x8   :  { %2629 = shalt.err (!%p2626_p2)
}
   0x9   :  { %s2630_s18 = scalar_lea.vmem %s16_s10, 1152  ;;  %p2635_p4 = scmp.lt.s32.totalorder %s16_s10, %s16_s10 }
   0xa   :  { %p2631_p3 = scmp.ne.s32.totalorder %s16_s10, %s2630_s18  ;;  %p2636_p5 = scmp.lt.s32.totalorder %s2630_s18, %s2630_s18 }
   0xc   :  { %p2637_p6 = por %p2636_p5, %p2635_p4 }
   0xe   :  { %p2638_p7 = pnand %p2637_p6, %p2631_p3 }
  0x10   :  { %2641 = shalt.err (!%p2638_p7)
}
  0x11   :  { %s2693_s19 = smov 128   ;;  %s2694_s20 = smov 8  }
  0x12   :  { %21 = dma.hbm_to_vmem [thread:$0]  %s2944_s0, 1152, %s16_s10, [#allocation3], %s2693_s19, %s2693_s19, %s2694_s20  }
  0x13   :  { %s2695_s23 = smov [#allocation5]   ;;  %s2642_s27 = scalar_lea.hbm %s2945_s1, 11136 }
  0x14   :  { %s27_s24 = sshll.u32 %s2695_s23, 4  ;;  %p2643_p8 = scmp.ne.s32.totalorder %s2945_s1, %s2642_s27  ;;  %s28_s24 = int_to_ptr.vmem [resolvable:$true] %s27_s24 }
  0x15   :  { %p2646_p9 = scmp.lt.u32.totalorder %s2642_s27, %s2945_s1 }
  0x17   :  { %p2648_p10 = pnand %p2646_p9, %p2643_p8 }
  0x19   :  { %2651 = shalt.err (!%p2648_p10)
}
  0x1a   :  { %s2652_s4 = scalar_lea.vmem %s28_s24, 11136  ;;  %p2657_p12 = scmp.lt.s32.totalorder %s28_s24, %s28_s24 }
  0x1b   :  { %p2653_p11 = scmp.ne.s32.totalorder %s28_s24, %s2652_s4  ;;  %p2658_p13 = scmp.lt.s32.totalorder %s2652_s4, %s2652_s4 }
  0x1d   :  { %p2659_p0 = por %p2658_p13, %p2657_p12 }
  0x1f   :  { %p2660_p1 = pnand %p2659_p0, %p2653_p11 }
  0x21   :  { %2663 = shalt.err (!%p2660_p1)
}
  0x22   :  { %33 = dma.hbm_to_vmem [thread:$0]  %s2945_s1, 11136, %s28_s24, [#allocation6], %s2693_s19, %s2693_s19, %s2694_s20  }
  0x23   :  { %2686 = dma.done.wait [#allocation3], 1152  }
  0x24   :  { %2687 = vsyncadd [#allocation3], 4294966144 }
  0x25   :  { %2688 = dma.done.wait [#allocation6], 11136  }
  0x26   :  { %2689 = vsyncadd [#allocation6], 4294956160  ;;  %v2696_v0 = vmov 0.0|0.0   ;;  %vm2697_vm0 = vmmov 0   ;;  %v2698_v1 = vmov 0.0   ;;  %v49_v2 = vld [vmem:[#allocation5] sm:$0xff] }
  0x27   :  { %2382 = vmatprep.subr.bf16.mxu1 %v2696_v0  ;;  %2109 = vmatprep.mubr.msk.f32.mxu1 %vm2697_vm0, %v2698_v1  ;;  %v50_v3 = vld [vmem:[#allocation5 + $0x8] sm:$0xff]  ;;  %v51_v4 = vld [vmem:[#allocation5 + $0x10] sm:$0xff]  ;;  %v52_v6 = vld [vmem:[#allocation5 + $0x18] sm:$0xff]  ;;  %vm262_vm1 = vcmask 261120   ;;  %s2699_s1 = smov 64   ;;  %s2700_s6 = smov 32  }
  0x28   :  { %v2347_v5 = vpack.c.bf16 %v50_v3, %v49_v2  ;;  %v2351_v7 = vpack.c.bf16 %v52_v6, %v51_v4  ;;  %v53_v8 = vld [vmem:[#allocation5 + $0x20] sm:$0xff]  ;;  %v54_v9 = vld [vmem:[#allocation5 + $0x28] sm:$0xff]  ;;  %v55_v12 = vld [vmem:[#allocation5 + $0x30] sm:$0xff]  ;;  %vm189_vm2 = vcmask 130048   ;;  %vm1860_vm3 = vcmask 523264   ;;  %s2701_s7 = smov [#allocation7]  }
  0x29   :  { %v175_v10 = vld [vmem:[#allocation5 + $0x80] sm:$0xff]  ;;  %v2355_v11 = vpack.c.bf16 %v54_v9, %v53_v8  ;;  %v56_v13 = vld [vmem:[#allocation5 + $0x38] sm:$0xff]  ;;  %v176_v14 = vld [vmem:[#allocation5 + $0x88] sm:$0xff]  ;;  %s1870_s8 = sshll.u32 %s2701_s7, 4  ;;  %s1871_s8 = int_to_ptr.vmem [resolvable:$true] %s1870_s8 }
  0x2a   :  { %2348 = vmatprep.subr.bf16.mxu0 %v2347_v5  ;;  %v2744_v15 = vpack.c.bf16 %v176_v14, %v175_v10  ;;  %v41_v16 = vld [vmem:[#allocation2] sm:$0xff]  ;;  %v177_v17 = vld [vmem:[#allocation5 + $0x90] sm:$0xff]  ;;  %v2359_v20 = vpack.c.bf16 %v56_v13, %v55_v12  ;;  %v57_v21 = vld [vmem:[#allocation5 + $0x40] sm:$0xff]  ;;  %s2664_s9 = scalar_lea.vmem %s1871_s8, 256  ;;  %p2669_p3 = scmp.lt.s32.totalorder %s1871_s8, %s1871_s8 }
  0x2b   :  { %2350 = vmatpush3.bf16.msra.mxu0 %v2347_v5  ;;  %v178_v18 = vld [vmem:[#allocation5 + $0x98] sm:$0xff]  ;;  %2082 = vmatprep.mubr.f32.mxu0 %v41_v16  ;;  %v58_v22 = vld [vmem:[#allocation5 + $0x48] sm:$0xff]  ;;  %v59_v25 = vld [vmem:[#allocation5 + $0x50] sm:$0xff]  ;;  %p2665_p2 = scmp.ne.s32.totalorder %s1871_s8, %s2664_s9  ;;  %p2670_p4 = scmp.lt.s32.totalorder %s2664_s9, %s2664_s9 }
  0x2c   :  { %2352 = vmatprep.subr.bf16.mxu0 %v2351_v7  ;;  %2384 = vmatpush3.bf16.msra.mxu1 %v2744_v15  ;;  %v2747_v19 = vpack.c.bf16 %v178_v18, %v177_v17  ;;  %v2751_v23 = vld [vmem:[#allocation2 + $0x40] sm:$0xff]  ;;  %v2363_v24 = vpack.c.bf16 %v58_v22, %v57_v21  ;;  %v61_v28 = vld [vmem:[#allocation5 + $0x60] sm:$0xff]  ;;  %v62_v29 = vld [vmem:[#allocation5 + $0x68] sm:$0xff] }
  0x2d   :  { %2385 = vmatprep.subr.bf16.mxu1 %v2696_v0  ;;  %v60_v26 = vld [vmem:[#allocation5 + $0x58] sm:$0xff]  ;;  %v2371_v30 = vpack.c.bf16 %v62_v29, %v61_v28  ;;  %v63_v31 = vld [vmem:[#allocation5 + $0x70] sm:$0xff]  ;;  %v42_v34 = vld [vmem:[#allocation2 + $0x8] sm:$0xff]  ;;  %p2671_p5 = por %p2670_p4, %p2669_p3 }
  0x2e   :  { %v2367_v27 = vpack.c.bf16 %v60_v26, %v59_v25  ;;  %v64_v32 = vld [vmem:[#allocation5 + $0x78] sm:$0xff]  ;;  %v2759_v37 = vld [vmem:[#allocation5 + $0x2b0] ss:$0 sm:$0xff]  ;;  %v360_v52 = vld [vmem:[#allocation5 + $0xa0] sm:$0xff] }
  0x2f   :  { %2354 = vmatpush3.bf16.msra.mxu0 %v2351_v7  ;;  %v2375_v33 = vpack.c.bf16 %v64_v32, %v63_v31  ;;  %v361_v53 = vld [vmem:[#allocation5 + $0xa8] sm:$0xff]  ;;  %v362_v54 = vld [vmem:[#allocation5 + $0xb0] sm:$0xff]  ;;  %v363_v56 = vld [vmem:[#allocation5 + $0xb8] sm:$0xff]  ;;  %p2672_p6 = pnand %p2671_p5, %p2665_p2 }
  0x30   :  { %2356 = vmatprep.subr.bf16.mxu0 %v2355_v11  ;;  %2387 = vmatpush3.bf16.msra.mxu1 %v2747_v19  ;;  %v2389_v55 = vpack.c.bf16 %v361_v53, %v360_v52  ;;  %v2392_v57 = vpack.c.bf16 %v363_v56, %v362_v54  ;;  %v535_v14 = vld [vmem:[#allocation5 + $0xc0] sm:$0xff]  ;;  %v536_v16 = vld [vmem:[#allocation5 + $0xc8] sm:$0xff]  ;;  %v537_v17 = vld [vmem:[#allocation5 + $0xd0] sm:$0xff] }
  0x31   :  { %2388 = vmatprep.subr.bf16.mxu1 %v2696_v0  ;;  %v2401_v18 = vpack.c.bf16 %v536_v16, %v535_v14  ;;  %v44_v25 = vld [vmem:[#allocation2 + $0x18] sm:$0xff]  ;;  %v710_v52 = vld [vmem:[#allocation5 + $0xe0] sm:$0xff]  ;;  %v711_v53 = vld [vmem:[#allocation5 + $0xe8] sm:$0xff] }
  0x32   :  { %v712_v54 = vld [vmem:[#allocation5 + $0xf0] sm:$0xff]  ;;  %v713_v56 = vld [vmem:[#allocation5 + $0xf8] sm:$0xff] }
  0x33   :  { %2358 = vmatpush3.bf16.msra.mxu0 %v2355_v11  ;;  %2110 = vmatmul.mubr.msk.f32.vlgmr.msra.gmra.mrb[0].mxu1 %vm262_vm1, %v2751_v23 }
  0x34   :  { %2360 = vmatprep.subr.bf16.mxu0 %v2359_v20  ;;  %2120 = vmatprep.mubr.msk.f32.mxu1 %vm2697_vm0, %v2698_v1 }
  0x35   :  { %2390 = vmatpush3.bf16.msra.mxu1 %v2389_v55  ;;  %v2413_v55 = vpack.c.bf16 %v711_v53, %v710_v52  ;;  %v1063_v53 = vld [vmem:[#allocation5 + $0x138] sm:$0xff] }
  0x36   :  { %2391 = vmatprep.subr.bf16.mxu1 %v2696_v0 }
  0x37   :  { %2362 = vmatpush3.bf16.msra.mxu0 %v2359_v20  ;;  %v538_v20 = vld [vmem:[#allocation5 + $0xd8] sm:$0xff] }
  0x38   :  { %2364 = vmatprep.subr.bf16.mxu0 %v2363_v24  ;;  %v2404_v21 = vpack.c.bf16 %v538_v20, %v537_v17 }
  0x39   :  { %2393 = vmatpush3.bf16.msra.mxu1 %v2392_v57  ;;  %v2416_v57 = vpack.c.bf16 %v713_v56, %v712_v54 }
  0x3a   :  { %2394 = vmatprep.subr.bf16.mxu1 %v2696_v0 }
  0x3b   :  { %2366 = vmatpush3.bf16.msra.mxu0 %v2363_v24  ;;  %v43_v24 = vld [vmem:[#allocation2 + $0x10] sm:$0xff] }
  0x3c   :  { %2368 = vmatprep.subr.bf16.mxu0 %v2367_v27 }
  0x3f   :  { %2370 = vmatpush3.bf16.msra.mxu0 %v2367_v27 }
  0x40   :  { %2372 = vmatprep.subr.bf16.mxu0 %v2371_v30 }
  0x43   :  { %2374 = vmatpush3.bf16.msra.mxu0 %v2371_v30 }
  0x44   :  { %2376 = vmatprep.subr.bf16.mxu0 %v2375_v33 }
  0x47   :  { %2378 = vmatpush3.bf16.msra.mxu0 %v2375_v33 }
  0x48   :  { %2379 = vmatprep.subr.bf16.mxu0 %v2696_v0 }
  0x4a   :  { %2083 = vmatmul.mubr.f32.vlgmr.msra.gmra.mrb[0].mxu0 %v42_v34 }
  0x4b   :  { %2085 = vmatprep.mubr.f32.mxu0 %v43_v24  ;;  %v885_v24 = vld [vmem:[#allocation5 + $0x100] sm:$0xff] }
  0x4e   :  { %2086 = vmatmul.mubr.f32.gmra.mrb[2].mxu0 %v44_v25  ;;  %v886_v25 = vld [vmem:[#allocation5 + $0x108] sm:$0xff] }
 0x106   :  { %v331_v35 = vpop.f32.mrb[0].mxu1 }
 0x107   :  { %v2111_v36 = vpop.f32.mrb[1].mxu1 }
 0x11d   :  { %v2084_v38 = vpop.f32.mrb[0].mxu0 }
 0x11e   :  { %v136_v39 = vpop.f32.mrb[1].mxu0  ;;  %v142_v62 = vadd.f32 %v2084_v38, %v2759_v37 }
 0x11f   :  { %v137_v40 = vadd.f32 %v2759_v37, %v136_v39 }
 0x121   :  { %v335_v41 = vadd.f32 %v331_v35, %v137_v40  ;;  %v2796_v29 = vpop.f32.mrb[2].mxu0 }
 0x122   :  { %v146_v30 = vpop.f32.mrb[3].mxu0 }
 0x123   :  { %2552 = vtanh.f32 %v335_v41  ;;  %v1884_v43 = vmul.f32 -1.442695, %v335_v41  ;;  %v147_v31 = vadd.f32 %v2759_v37, %v146_v30 }
 0x125   :  { %2554 = vpow2.f32 %v1884_v43 }
 0x12d   :  { %v2553_v42 = vpop.eup %2552 }
 0x12e   :  { %345 = vrot.lane.b32.xlu0 %v2553_v42, %s2699_s1 }
 0x12f   :  { %v2555_v44 = vpop.eup %2554 }
 0x130   :  { %v339_v45 = vadd.f32 1.0, %v2555_v44 }
 0x132   :  { %2556 = vrcp.f32 %v339_v45 }
 0x13c   :  { %v2557_v46 = vpop.eup %2556 }
 0x13d   :  { %v343_v49 = vmul.f32 %v2557_v46, %v2751_v23 }
 0x1a0   :  { %v346_v47 = vpop.permute.xlu0 %345 }
 0x1a1   :  { %v348_v48 = vmul.f32 %v2557_v46, %v346_v47  ;;  %v180_v47 = vld [vmem:[#allocation5 + $0x1a8] sm:$0xff] }
 0x1a3   :  { %350 = vrot.lane.b32.xlu0 %v348_v48, %s2700_s6  ;;  %v45_v48 = vld [vmem:[#allocation2 + $0x20] sm:$0xff] }
 0x1a4   :  { %2088 = vmatprep.mubr.f32.mxu0 %v45_v48 }
 0x215   :  { %v351_v50 = vpop.permute.xlu0 %350 }
 0x216   :  { %v353_v51 = vadd.f32 %v351_v50, %v343_v49  ;;  %v46_v50 = vld [vmem:[#allocation2 + $0x28] sm:$0xff] }
 0x217   :  { %2089 = vmatmul.mubr.f32.gmra.mrb[4].mxu0 %v46_v50  ;;  %v1061_v50 = vld [vmem:[#allocation5 + $0x128] sm:$0xff] }
 0x218   :  { %2558 = vtanh.f32 %v353_v51 }
 0x222   :  { %v2559_v58 = vpop.eup %2558 }
 0x223   :  { %356 = vrot.lane.b32.xlu1 %v2559_v58, %s2699_s1 }
 0x295   :  { %v357_v59 = vpop.permute.xlu1 %356 }
 0x296   :  { %v359_v60 = vmul.f32 %v2557_v46, %v357_v59  ;;  %v179_v46 = vld [vmem:[#allocation5 + $0x1a0] sm:$0xff] }
 0x297   :  { %v2380_v49 = vpack.c.bf16 %v180_v47, %v179_v46 }
 0x298   :  { %365 = vrot.lane.b32.xlu1 %v359_v60, %s2700_s6 }
 0x299   :  { %2381 = vmatpush3.bf16.msra.mxu0 %v2380_v49  ;;  %v1060_v49 = vld [vmem:[#allocation5 + $0x120] sm:$0xff] }
 0x29a   :  { %2418 = vmatprep.subr.bf16.mxu0 %v2696_v0  ;;  %v2437_v52 = vpack.c.bf16 %v1061_v50, %v1060_v49 }
 0x30a   :  { %v366_v61 = vpop.permute.xlu1 %365 }
 0x30b   :  { %2121 = vmatmul.mubr.msk.f32.vlgmr.msra.gmra.mrb[2].mxu1 %vm262_vm1, %v366_v61 }
 0x30c   :  { %2396 = vmatpush3.bf16.msra.mxu1 %v2744_v15  ;;  %2131 = vmatprep.mubr.msk.f32.mxu1 %vm2697_vm0, %v2698_v1 }
 0x30d   :  { %2397 = vmatprep.subr.bf16.mxu1 %v2696_v0 }
 0x310   :  { %2399 = vmatpush3.bf16.msra.mxu1 %v2747_v19 }
 0x311   :  { %2400 = vmatprep.subr.bf16.mxu1 %v2696_v0 }
 0x313   :  { %2132 = vmatmul.mubr.msk.f32.vlgmr.msra.gmra.mrb[4].mxu1 %vm262_vm1, %v366_v61 }
 0x314   :  { %2142 = vmatprep.mubr.msk.f32.mxu1 %vm2697_vm0, %v2698_v1  ;;  %2402 = vmatpush3.bf16.msra.mxu1 %v2401_v18 }
 0x315   :  { %2403 = vmatprep.subr.bf16.mxu1 %v2696_v0 }
 0x318   :  { %2405 = vmatpush3.bf16.msra.mxu1 %v2404_v21 }
 0x319   :  { %2406 = vmatprep.subr.bf16.mxu1 %v2696_v0 }
 0x3e6   :  { %v506_v63 = vpop.f32.mrb[4].mxu1 }
 0x3e7   :  { %v510_v2 = vadd.f32 %v506_v63, %v142_v62  ;;  %v2133_v3 = vpop.f32.mrb[5].mxu1  ;;  %v2819_v62 = vpop.f32.mrb[4].mxu0 }
 0x3e8   :  { %v156_v63 = vpop.f32.mrb[5].mxu0 }
 0x3e9   :  { %2560 = vtanh.f32 %v510_v2  ;;  %v1887_v5 = vmul.f32 -1.442695, %v510_v2 }
 0x3eb   :  { %2562 = vpow2.f32 %v1887_v5 }
 0x3f3   :  { %v2561_v4 = vpop.eup %2560 }
 0x3f4   :  { %520 = vrot.lane.b32.xlu0 %v2561_v4, %s2699_s1 }
 0x3f5   :  { %v2563_v6 = vpop.eup %2562 }
 0x3f6   :  { %v514_v7 = vadd.f32 1.0, %v2563_v6 }
 0x3f8   :  { %2564 = vrcp.f32 %v514_v7  ;;  %v152_v7 = vadd.f32 %v2796_v29, %v2759_v37 }
 0x402   :  { %v2565_v8 = vpop.eup %2564 }
 0x403   :  { %v518_v11 = vmul.f32 %v2565_v8, %v353_v51  ;;  %v47_v51 = vld [vmem:[#allocation2 + $0x30] sm:$0xff] }
 0x404   :  { %2091 = vmatprep.mubr.f32.mxu0 %v47_v51  ;;  %v1062_v51 = vld [vmem:[#allocation5 + $0x130] sm:$0xff] }
 0x405   :  { %v2440_v54 = vpack.c.bf16 %v1063_v53, %v1062_v51 }
 0x466   :  { %v521_v9 = vpop.permute.xlu0 %520 }
 0x467   :  { %v523_v10 = vmul.f32 %v2565_v8, %v521_v9 }
 0x469   :  { %525 = vrot.lane.b32.xlu1 %v523_v10, %s2700_s6 }
 0x4db   :  { %v526_v12 = vpop.permute.xlu1 %525 }
 0x4dc   :  { %v528_v13 = vadd.f32 %v526_v12, %v518_v11 }
 0x4de   :  { %2566 = vtanh.f32 %v528_v13 }
 0x4e8   :  { %v2567_v22 = vpop.eup %2566 }
 0x4e9   :  { %531 = vrot.lane.b32.xlu0 %v2567_v22, %s2699_s1 }
 0x55b   :  { %v532_v26 = vpop.permute.xlu0 %531 }
 0x55c   :  { %v534_v27 = vmul.f32 %v2565_v8, %v532_v26  ;;  %v887_v26 = vld [vmem:[#allocation5 + $0x110] sm:$0xff] }
 0x55e   :  { %540 = vrot.lane.b32.xlu1 %v534_v27, %s2700_s6  ;;  %v2425_v27 = vpack.c.bf16 %v886_v25, %v885_v24 }
 0x5d0   :  { %v541_v28 = vpop.permute.xlu1 %540 }
 0x5d1   :  { %2143 = vmatmul.mubr.msk.f32.vlgmr.msra.gmra.mrb[2].mxu1 %vm262_vm1, %v541_v28 }
 0x5d2   :  { %2408 = vmatpush3.bf16.msra.mxu1 %v2744_v15  ;;  %2153 = vmatprep.mubr.msk.f32.mxu1 %vm2697_vm0, %v2698_v1 }
 0x5d3   :  { %2409 = vmatprep.subr.bf16.mxu1 %v2696_v0 }
 0x5d6   :  { %2411 = vmatpush3.bf16.msra.mxu1 %v2747_v19 }
 0x5d7   :  { %2412 = vmatprep.subr.bf16.mxu1 %v2696_v0 }
 0x5d9   :  { %2154 = vmatmul.mubr.msk.f32.vlgmr.msra.gmra.mrb[6].mxu1 %vm262_vm1, %v541_v28  ;;  %v888_v28 = vld [vmem:[#allocation5 + $0x118] sm:$0xff] }
 0x5da   :  { %2164 = vmatprep.mubr.msk.f32.mxu1 %vm2697_vm0, %v2698_v1  ;;  %2414 = vmatpush3.bf16.msra.mxu1 %v2413_v55  ;;  %v2428_v29 = vpack.c.bf16 %v888_v28, %v887_v26 }
 0x5db   :  { %2415 = vmatprep.subr.bf16.mxu1 %v2696_v0 }
 0x5de   :  { %2417 = vmatpush3.bf16.msra.mxu1 %v2416_v57 }
 0x5df   :  { %2424 = vmatprep.subr.bf16.mxu1 %v2696_v0 }
 0x6ac   :  { %v681_v32 = vpop.f32.mrb[6].mxu1 }
 0x6ad   :  { %v685_v33 = vadd.f32 %v681_v32, %v147_v31  ;;  %v2155_v34 = vpop.f32.mrb[7].mxu1 }
 0x6ae   :  { %v157_v34 = vadd.f32 %v2759_v37, %v156_v63 }
 0x6af   :  { %2568 = vtanh.f32 %v685_v33  ;;  %v1890_v36 = vmul.f32 -1.442695, %v685_v33 }
 0x6b1   :  { %2570 = vpow2.f32 %v1890_v36 }
 0x6b9   :  { %v2569_v35 = vpop.eup %2568 }
 0x6ba   :  { %695 = vrot.lane.b32.xlu0 %v2569_v35, %s2699_s1 }
 0x6bb   :  { %v2571_v38 = vpop.eup %2570 }
 0x6bc   :  { %v689_v39 = vadd.f32 1.0, %v2571_v38 }
 0x6be   :  { %2572 = vrcp.f32 %v689_v39 }
 0x6c8   :  { %v2573_v40 = vpop.eup %2572 }
 0x6c9   :  { %v693_v43 = vmul.f32 %v2573_v40, %v528_v13 }
 0x72c   :  { %v696_v41 = vpop.permute.xlu0 %695 }
 0x72d   :  { %v698_v42 = vmul.f32 %v2573_v40, %v696_v41 }
 0x72f   :  { %700 = vrot.lane.b32.xlu1 %v698_v42, %s2700_s6 }
 0x733   :  { %187 = vrot.lane.b32.xlu1 %v2751_v23, %s2699_s1  ;;  %v48_v23 = vld [vmem:[#allocation2 + $0x38] sm:$0xff] }
 0x734   :  { %2092 = vmatmul.mubr.f32.gmra.mrb[6].mxu0 %v48_v23 }
 0x735   :  { %2098 = vmatprep.mubr.msk.f32.mxu0 %vm2697_vm0, %v2698_v1 }
 0x7a1   :  { %v701_v44 = vpop.permute.xlu1 %700 }
 0x7a2   :  { %v2803_v45 = vadd.f32 %v701_v44, %v693_v43 }
 0x7a4   :  { %2574 = vtanh.f32 %v2803_v45 }
 0x7a5   :  { %v188_v58 = vpop.permute.xlu1 %187 }
 0x7a6   :  { %2099 = vmatmul.mubr.msk.f32.vlgmr.msra.gmra.mrb[8].mxu0 %vm189_vm2, %v188_v58  ;;  %v162_v58 = vadd.f32 %v2819_v62, %v2759_v37 }
 0x7a7   :  { %2420 = vmatpush3.bf16.msra.mxu0 %v2744_v15  ;;  %2175 = vmatprep.mubr.msk.f32.mxu0 %vm2697_vm0, %v2698_v1 }
 0x7a8   :  { %2421 = vmatprep.subr.bf16.mxu0 %v2696_v0 }
 0x7ab   :  { %2423 = vmatpush3.bf16.msra.mxu0 %v2747_v19 }
 0x7ac   :  { %2430 = vmatprep.subr.bf16.mxu0 %v2696_v0 }
 0x7ae   :  { %v2575_v59 = vpop.eup %2574 }
 0x7af   :  { %706 = vrot.lane.b32.xlu0 %v2575_v59, %s2699_s1 }
 0x807   :  { %v2821_v2 = vpop.f32.mrb[6].mxu0 }
 0x808   :  { %v2823_v3 = vpop.f32.mrb[7].mxu0 }
 0x809   :  { %v167_v26 = vadd.f32 %v2759_v37, %v2823_v3 }
 0x821   :  { %v707_v60 = vpop.permute.xlu0 %706 }
 0x822   :  { %v709_v61 = vmul.f32 %v2573_v40, %v707_v60 }
 0x824   :  { %715 = vrot.lane.b32.xlu0 %v709_v61, %s2700_s6 }
 0x879   :  { %v2825_v4 = vpop.f32.mrb[8].mxu0 }
 0x87a   :  { %v2100_v5 = vpop.f32.mrb[9].mxu0 }
 0x896   :  { %v716_v6 = vpop.permute.xlu0 %715 }
 0x897   :  { %2165 = vmatmul.mubr.msk.f32.vlgmr.msra.gmra.mrb[2].mxu1 %vm262_vm1, %v716_v6  ;;  %2176 = vmatmul.mubr.msk.f32.vlgmr.msra.gmra.mrb[10].mxu0 %vm262_vm1, %v716_v6 }
 0x898   :  { %2432 = vmatpush3.bf16.msra.mxu0 %v2744_v15  ;;  %2197 = vmatprep.mubr.msk.f32.mxu0 %vm2697_vm0, %v2698_v1 }
 0x899   :  { %2433 = vmatprep.subr.bf16.mxu0 %v2696_v0  ;;  %2186 = vmatprep.mubr.msk.f32.mxu1 %vm2697_vm0, %v2698_v1 }
 0x89a   :  { %2426 = vmatpush3.bf16.msra.mxu1 %v2425_v27 }
 0x89b   :  { %2427 = vmatprep.subr.bf16.mxu1 %v2696_v0 }
 0x89c   :  { %2435 = vmatpush3.bf16.msra.mxu0 %v2747_v19 }
 0x89d   :  { %2442 = vmatprep.subr.bf16.mxu0 %v2696_v0 }
 0x89e   :  { %2429 = vmatpush3.bf16.msra.mxu1 %v2428_v29 }
 0x89f   :  { %2436 = vmatprep.subr.bf16.mxu1 %v2696_v0 }
 0x96a   :  { %v856_v8 = vpop.f32.mrb[10].mxu0 }
 0x96b   :  { %v860_v9 = vadd.f32 %v856_v8, %v152_v7  ;;  %v2177_v10 = vpop.f32.mrb[11].mxu0 }
 0x96d   :  { %2576 = vtanh.f32 %v860_v9  ;;  %v1893_v12 = vmul.f32 -1.442695, %v860_v9 }
 0x96f   :  { %2578 = vpow2.f32 %v1893_v12 }
 0x977   :  { %v2577_v11 = vpop.eup %2576 }
 0x978   :  { %870 = vrot.lane.b32.xlu1 %v2577_v11, %s2699_s1 }
 0x979   :  { %v2579_v13 = vpop.eup %2578 }
 0x97a   :  { %v864_v14 = vadd.f32 1.0, %v2579_v13  ;;  %v1235_v13 = vld [vmem:[#allocation5 + $0x140] sm:$0xff] }
 0x97c   :  { %2580 = vrcp.f32 %v864_v14  ;;  %v1236_v14 = vld [vmem:[#allocation5 + $0x148] sm:$0xff] }
 0x986   :  { %v2581_v16 = vpop.eup %2580 }
 0x987   :  { %v868_v20 = vmul.f32 %v2581_v16, %v2803_v45 }
 0x9ea   :  { %v871_v17 = vpop.permute.xlu1 %870 }
 0x9eb   :  { %v873_v18 = vmul.f32 %v2581_v16, %v871_v17  ;;  %v2449_v17 = vpack.c.bf16 %v1236_v14, %v1235_v13  ;;  %v1670_v13 = vld [vmem:[#allocation5 + $0x1d0] sm:$0xff]  ;;  %v1671_v14 = vld [vmem:[#allocation5 + $0x1d8] sm:$0xff] }
 0x9ed   :  { %875 = vrot.lane.b32.xlu0 %v873_v18, %s2700_s6  ;;  %v1238_v18 = vld [vmem:[#allocation5 + $0x158] sm:$0xff] }
 0xa5f   :  { %v876_v21 = vpop.permute.xlu0 %875 }
 0xa60   :  { %v878_v22 = vadd.f32 %v876_v21, %v868_v20 }
 0xa62   :  { %2582 = vtanh.f32 %v878_v22 }
 0xa6c   :  { %v2583_v30 = vpop.eup %2582 }
 0xa6d   :  { %881 = vrot.lane.b32.xlu1 %v2583_v30, %s2699_s1 }
 0xadf   :  { %v882_v31 = vpop.permute.xlu1 %881 }
 0xae0   :  { %v884_v32 = vmul.f32 %v2581_v16, %v882_v31  ;;  %v1237_v16 = vld [vmem:[#allocation5 + $0x150] sm:$0xff] }
 0xae1   :  { %v2452_v20 = vpack.c.bf16 %v1238_v18, %v1237_v16  ;;  %v2485_v16 = vpack.c.bf16 %v1671_v14, %v1670_v13  ;;  %v1672_v18 = vld [vmem:[#allocation5 + $0x1e0] sm:$0xff] }
 0xae2   :  { %890 = vrot.lane.b32.xlu0 %v884_v32, %s2700_s6 }
 0xb54   :  { %v891_v33 = vpop.permute.xlu0 %890 }
 0xb55   :  { %2187 = vmatmul.mubr.msk.f32.vlgmr.msra.gmra.mrb[2].mxu1 %vm262_vm1, %v891_v33  ;;  %2198 = vmatmul.mubr.msk.f32.vlgmr.msra.gmra.mrb[12].mxu0 %vm262_vm1, %v891_v33 }
 0xb56   :  { %2444 = vmatpush3.bf16.msra.mxu0 %v2744_v15  ;;  %2219 = vmatprep.mubr.msk.f32.mxu0 %vm2697_vm0, %v2698_v1 }
 0xb57   :  { %2445 = vmatprep.subr.bf16.mxu0 %v2696_v0  ;;  %2208 = vmatprep.mubr.msk.f32.mxu1 %vm2697_vm0, %v2698_v1 }
 0xb58   :  { %2438 = vmatpush3.bf16.msra.mxu1 %v2437_v52 }
 0xb59   :  { %2439 = vmatprep.subr.bf16.mxu1 %v2696_v0 }
 0xb5a   :  { %2447 = vmatpush3.bf16.msra.mxu0 %v2747_v19 }
 0xb5b   :  { %2454 = vmatprep.subr.bf16.mxu0 %v2696_v0 }
 0xb5c   :  { %2441 = vmatpush3.bf16.msra.mxu1 %v2440_v54 }
 0xb5d   :  { %2448 = vmatprep.subr.bf16.mxu1 %v2696_v0 }
 0xc28   :  { %v1031_v35 = vpop.f32.mrb[12].mxu0 }
 0xc29   :  { %v1035_v36 = vadd.f32 %v1031_v35, %v157_v34  ;;  %v2199_v38 = vpop.f32.mrb[13].mxu0 }
 0xc2a   :  { %v1410_v38 = vld [vmem:[#allocation5 + $0x160] sm:$0xff] }
 0xc2b   :  { %2584 = vtanh.f32 %v1035_v36  ;;  %v1896_v40 = vmul.f32 -1.442695, %v1035_v36 }
 0xc2d   :  { %2586 = vpow2.f32 %v1896_v40  ;;  %v1412_v40 = vld [vmem:[#allocation5 + $0x170] sm:$0xff] }
 0xc35   :  { %v2585_v39 = vpop.eup %2584 }
 0xc36   :  { %1045 = vrot.lane.b32.xlu1 %v2585_v39, %s2699_s1  ;;  %v1411_v39 = vld [vmem:[#allocation5 + $0x168] sm:$0xff] }
 0xc37   :  { %v2587_v41 = vpop.eup %2586 }
 0xc38   :  { %v1039_v42 = vadd.f32 1.0, %v2587_v41  ;;  %v2461_v41 = vpack.c.bf16 %v1411_v39, %v1410_v38  ;;  %v1759_v38 = vld [vmem:[#allocation5 + $0x238] sm:$0xff]  ;;  %v1760_v39 = vld [vmem:[#allocation5 + $0x240] sm:$0xff] }
 0xc3a   :  { %2588 = vrcp.f32 %v1039_v42  ;;  %v1413_v42 = vld [vmem:[#allocation5 + $0x178] sm:$0xff] }
 0xc44   :  { %v2589_v43 = vpop.eup %2588 }
 0xc45   :  { %v1043_v46 = vmul.f32 %v2589_v43, %v878_v22 }
 0xca8   :  { %v1046_v44 = vpop.permute.xlu1 %1045 }
 0xca9   :  { %v1048_v45 = vmul.f32 %v2589_v43, %v1046_v44 }
 0xcab   :  { %1050 = vrot.lane.b32.xlu0 %v1048_v45, %s2700_s6 }
 0xd1d   :  { %v1051_v47 = vpop.permute.xlu0 %1050 }
 0xd1e   :  { %v1053_v48 = vadd.f32 %v1051_v47, %v1043_v46 }
 0xd20   :  { %2590 = vtanh.f32 %v1053_v48 }
 0xd2a   :  { %v2591_v23 = vpop.eup %2590 }
 0xd2b   :  { %1056 = vrot.lane.b32.xlu1 %v2591_v23, %s2699_s1 }
 0xd9d   :  { %v1057_v55 = vpop.permute.xlu1 %1056 }
 0xd9e   :  { %v1059_v56 = vmul.f32 %v2589_v43, %v1057_v55  ;;  %v2464_v43 = vpack.c.bf16 %v1413_v42, %v1412_v40 }
 0xda0   :  { %1065 = vrot.lane.b32.xlu0 %v1059_v56, %s2700_s6 }
 0xe12   :  { %v1066_v57 = vpop.permute.xlu0 %1065 }
 0xe13   :  { %2209 = vmatmul.mubr.msk.f32.vlgmr.msra.gmra.mrb[2].mxu1 %vm262_vm1, %v1066_v57  ;;  %2220 = vmatmul.mubr.msk.f32.vlgmr.msra.gmra.mrb[14].mxu0 %vm262_vm1, %v1066_v57 }
 0xe14   :  { %2456 = vmatpush3.bf16.msra.mxu0 %v2744_v15  ;;  %2241 = vmatprep.mubr.msk.f32.mxu0 %vm2697_vm0, %v2698_v1 }
 0xe15   :  { %2457 = vmatprep.subr.bf16.mxu0 %v2696_v0  ;;  %2230 = vmatprep.mubr.msk.f32.mxu1 %vm2697_vm0, %v2698_v1 }
 0xe16   :  { %2450 = vmatpush3.bf16.msra.mxu1 %v2449_v17 }
 0xe17   :  { %2451 = vmatprep.subr.bf16.mxu1 %v2696_v0 }
 0xe18   :  { %2459 = vmatpush3.bf16.msra.mxu0 %v2747_v19 }
 0xe19   :  { %2466 = vmatprep.subr.bf16.mxu0 %v2696_v0 }
 0xe1a   :  { %2453 = vmatpush3.bf16.msra.mxu1 %v2452_v20  ;;  %v1673_v20 = vld [vmem:[#allocation5 + $0x1e8] sm:$0xff] }
 0xe1b   :  { %2460 = vmatprep.subr.bf16.mxu1 %v2696_v0 }
 0xee6   :  { %v1206_v59 = vpop.f32.mrb[14].mxu0 }
 0xee7   :  { %v1210_v60 = vadd.f32 %v1206_v59, %v162_v58  ;;  %v2221_v61 = vpop.f32.mrb[15].mxu0 }
 0xee8   :  { %v1587_v61 = vld [vmem:[#allocation5 + $0x190] sm:$0xff] }
 0xee9   :  { %2592 = vtanh.f32 %v1210_v60  ;;  %v1899_v5 = vmul.f32 -1.442695, %v1210_v60  ;;  %v1586_v60 = vld [vmem:[#allocation5 + $0x188] sm:$0xff] }
 0xeeb   :  { %2594 = vpow2.f32 %v1899_v5  ;;  %v1588_v5 = vld [vmem:[#allocation5 + $0x198] sm:$0xff] }
 0xef3   :  { %v2593_v63 = vpop.eup %2592 }
 0xef4   :  { %1220 = vrot.lane.b32.xlu1 %v2593_v63, %s2699_s1 }
 0xef5   :  { %v2595_v6 = vpop.eup %2594 }
 0xef6   :  { %v1214_v7 = vadd.f32 1.0, %v2595_v6  ;;  %v2476_v6 = vpack.c.bf16 %v1588_v5, %v1587_v61  ;;  %v1773_v61 = vld [vmem:[#allocation5 + $0x2a8] sm:$0xff]  ;;  %v1907_v5 = vld [vmem:[#allocation5 + $0x2b2] ss:$0 sm:$0xff] }
 0xef8   :  { %2596 = vrcp.f32 %v1214_v7 }
 0xf02   :  { %v2597_v8 = vpop.eup %2596 }
 0xf03   :  { %v1218_v11 = vmul.f32 %v2597_v8, %v1053_v48  ;;  %v172_v48 = vadd.f32 %v2821_v2, %v2759_v37  ;;  %v1585_v2 = vld [vmem:[#allocation5 + $0x180] sm:$0xff] }
 0xf04   :  { %v2473_v63 = vpack.c.bf16 %v1586_v60, %v1585_v2  ;;  %v1772_v60 = vld [vmem:[#allocation5 + $0x2a0] sm:$0xff] }
 0xf66   :  { %v1221_v9 = vpop.permute.xlu1 %1220 }
 0xf67   :  { %v1223_v10 = vmul.f32 %v2597_v8, %v1221_v9  ;;  %v1667_v9 = vld [vmem:[#allocation5 + $0x1b8] sm:$0xff] }
 0xf69   :  { %1225 = vrot.lane.b32.xlu0 %v1223_v10, %s2700_s6  ;;  %v1668_v10 = vld [vmem:[#allocation5 + $0x1c0] sm:$0xff] }
 0xfdb   :  { %v1226_v12 = vpop.permute.xlu0 %1225 }
 0xfdc   :  { %v1228_v62 = vadd.f32 %v1226_v12, %v1218_v11  ;;  %v1669_v12 = vld [vmem:[#allocation5 + $0x1c8] sm:$0xff] }
 0xfde   :  { %2598 = vtanh.f32 %v1228_v62 }
 0xfe8   :  { %v2599_v21 = vpop.eup %2598 }
 0xfe9   :  { %1231 = vrot.lane.b32.xlu1 %v2599_v21, %s2699_s1 }
0x105b   :  { %v1232_v22 = vpop.permute.xlu1 %1231 }
0x105c   :  { %v1234_v24 = vmul.f32 %v2597_v8, %v1232_v22  ;;  %v1666_v8 = vld [vmem:[#allocation5 + $0x1b0] sm:$0xff]  ;;  %v2488_v22 = vpack.c.bf16 %v1673_v20, %v1672_v18 }
0x105d   :  { %v2479_v11 = vpack.c.bf16 %v1667_v9, %v1666_v8 }
0x105e   :  { %1240 = vrot.lane.b32.xlu0 %v1234_v24, %s2700_s6  ;;  %v1674_v24 = vld [vmem:[#allocation5 + $0x1f0] sm:$0xff] }
0x10d0   :  { %v1241_v25 = vpop.permute.xlu0 %1240 }
0x10d1   :  { %2231 = vmatmul.mubr.msk.f32.vlgmr.msra.gmra.mrb[2].mxu1 %vm262_vm1, %v1241_v25  ;;  %2242 = vmatmul.mubr.msk.f32.vlgmr.msra.gmra.mrb[16].mxu0 %vm262_vm1, %v1241_v25  ;;  %v1675_v25 = vld [vmem:[#allocation5 + $0x1f8] sm:$0xff] }
0x10d2   :  { %2468 = vmatpush3.bf16.msra.mxu0 %v2744_v15  ;;  %2263 = vmatprep.mubr.msk.f32.mxu0 %vm2697_vm0, %v2698_v1 }
0x10d3   :  { %2469 = vmatprep.subr.bf16.mxu0 %v2696_v0  ;;  %2252 = vmatprep.mubr.msk.f32.mxu1 %vm2697_vm0, %v2698_v1 }
0x10d4   :  { %2462 = vmatpush3.bf16.msra.mxu1 %v2461_v41  ;;  %v1761_v41 = vld [vmem:[#allocation5 + $0x248] sm:$0xff] }
0x10d5   :  { %2463 = vmatprep.subr.bf16.mxu1 %v2696_v0  ;;  %v2506_v42 = vpack.c.bf16 %v1761_v41, %v1760_v39 }
0x10d6   :  { %2471 = vmatpush3.bf16.msra.mxu0 %v2747_v19 }
0x10d7   :  { %2478 = vmatprep.subr.bf16.mxu0 %v2696_v0 }
0x10d8   :  { %2465 = vmatpush3.bf16.msra.mxu1 %v2464_v43  ;;  %v1762_v43 = vld [vmem:[#allocation5 + $0x250] sm:$0xff] }
0x10d9   :  { %2472 = vmatprep.subr.bf16.mxu1 %v2696_v0 }
0x11a4   :  { %v1381_v27 = vpop.f32.mrb[16].mxu0 }
0x11a5   :  { %v1385_v28 = vadd.f32 %v1381_v27, %v167_v26  ;;  %v2243_v29 = vpop.f32.mrb[17].mxu0  ;;  %v2491_v26 = vpack.c.bf16 %v1675_v25, %v1674_v24  ;;  %v1676_v27 = vld [vmem:[#allocation5 + $0x200] sm:$0xff] }
0x11a7   :  { %2600 = vtanh.f32 %v1385_v28  ;;  %v1902_v30 = vmul.f32 -1.442695, %v1385_v28  ;;  %v1677_v28 = vld [vmem:[#allocation5 + $0x208] sm:$0xff] }
0x11a8   :  { %v2494_v29 = vpack.c.bf16 %v1677_v28, %v1676_v27 }
0x11a9   :  { %2602 = vpow2.f32 %v1902_v30  ;;  %v1679_v30 = vld [vmem:[#allocation5 + $0x218] sm:$0xff] }
0x11b1   :  { %v2601_v15 = vpop.eup %2600 }
0x11b2   :  { %1395 = vrot.lane.b32.xlu1 %v2601_v15, %s2699_s1  ;;  %v1678_v15 = vld [vmem:[#allocation5 + $0x210] sm:$0xff] }
0x11b3   :  { %v2603_v31 = vpop.eup %2602 }
0x11b4   :  { %v1389_v32 = vadd.f32 1.0, %v2603_v31  ;;  %v2497_v31 = vpack.c.bf16 %v1679_v30, %v1678_v15 }
0x11b6   :  { %2604 = vrcp.f32 %v1389_v32 }
0x11c0   :  { %v2605_v33 = vpop.eup %2604 }
0x11c1   :  { %v1393_v35 = vmul.f32 %v2605_v33, %v1228_v62  ;;  %v2482_v62 = vpack.c.bf16 %v1669_v12, %v1668_v10  ;;  %v1908_v10 = vld [vmem:[#allocation5 + $0x2b3] ss:$0 sm:$0xff] }
0x1224   :  { %v1396_v34 = vpop.permute.xlu1 %1395 }
0x1225   :  { %v1398_v19 = vmul.f32 %v2605_v33, %v1396_v34 }
0x1227   :  { %1400 = vrot.lane.b32.xlu0 %v1398_v19, %s2700_s6  ;;  %v1680_v19 = vld [vmem:[#allocation5 + $0x220] sm:$0xff] }
0x1299   :  { %v1401_v36 = vpop.permute.xlu0 %1400 }
0x129a   :  { %v1403_v3 = vadd.f32 %v1401_v36, %v1393_v35  ;;  %v1681_v35 = vld [vmem:[#allocation5 + $0x228] sm:$0xff] }
0x129b   :  { %v2500_v36 = vpack.c.bf16 %v1681_v35, %v1680_v19 }
0x129c   :  { %2606 = vtanh.f32 %v1403_v3 }
0x12a6   :  { %v2607_v44 = vpop.eup %2606 }
0x12a7   :  { %1406 = vrot.lane.b32.xlu1 %v2607_v44, %s2699_s1  ;;  %v1763_v44 = vld [vmem:[#allocation5 + $0x258] sm:$0xff] }
0x1319   :  { %v1407_v45 = vpop.permute.xlu1 %1406 }
0x131a   :  { %v1409_v46 = vmul.f32 %v2605_v33, %v1407_v45  ;;  %v2509_v45 = vpack.c.bf16 %v1763_v44, %v1762_v43 }
0x131c   :  { %1415 = vrot.lane.b32.xlu0 %v1409_v46, %s2700_s6  ;;  %v1765_v46 = vld [vmem:[#allocation5 + $0x268] sm:$0xff] }
0x138e   :  { %v1416_v47 = vpop.permute.xlu0 %1415 }
0x138f   :  { %2253 = vmatmul.mubr.msk.f32.vlgmr.msra.gmra.mrb[2].mxu1 %vm262_vm1, %v1416_v47  ;;  %2264 = vmatmul.mubr.msk.f32.vlgmr.msra.gmra.mrb[18].mxu0 %vm262_vm1, %v1416_v47 }
0x1390   :  { %2274 = vmatprep.mubr.msk.f32.mxu1 %vm2697_vm0, %v2698_v1  ;;  %2309 = vmatprep.mubr.msk.f32.mxu0 %vm2697_vm0, %v2698_v1 }
0x1391   :  { %2474 = vmatpush3.bf16.msra.mxu1 %v2473_v63  ;;  %2480 = vmatpush3.bf16.msra.mxu0 %v2479_v11  ;;  %v2524_v63 = vpack.c.bf16 %v1773_v61, %v1772_v60 }
0x1392   :  { %2475 = vmatprep.subr.bf16.mxu1 %v2696_v0  ;;  %2481 = vmatprep.subr.bf16.mxu0 %v2696_v0 }
0x1395   :  { %2477 = vmatpush3.bf16.msra.mxu1 %v2476_v6  ;;  %2483 = vmatpush3.bf16.msra.mxu0 %v2482_v62 }
0x1396   :  { %2502 = vmatprep.subr.bf16.mxu1 %v2696_v0  ;;  %2484 = vmatprep.subr.bf16.mxu0 %v2696_v0 }
0x1399   :  { %2486 = vmatpush3.bf16.msra.mxu0 %v2485_v16 }
0x139a   :  { %2487 = vmatprep.subr.bf16.mxu0 %v2696_v0 }
0x139d   :  { %2489 = vmatpush3.bf16.msra.mxu0 %v2488_v22 }
0x139e   :  { %2490 = vmatprep.subr.bf16.mxu0 %v2696_v0 }
0x13a1   :  { %2492 = vmatpush3.bf16.msra.mxu0 %v2491_v26 }
0x13a2   :  { %2493 = vmatprep.subr.bf16.mxu0 %v2696_v0 }
0x13a5   :  { %2495 = vmatpush3.bf16.msra.mxu0 %v2494_v29 }
0x13a6   :  { %2496 = vmatprep.subr.bf16.mxu0 %v2696_v0 }
0x13a9   :  { %2498 = vmatpush3.bf16.msra.mxu0 %v2497_v31 }
0x13aa   :  { %2499 = vmatprep.subr.bf16.mxu0 %v2696_v0 }
0x13ad   :  { %2501 = vmatpush3.bf16.msra.mxu0 %v2500_v36 }
0x1462   :  { %v1556_v49 = vpop.f32.mrb[18].mxu0 }
0x1463   :  { %v1560_v50 = vadd.f32 %v1556_v49, %v172_v48  ;;  %v2265_v51 = vpop.f32.mrb[19].mxu0  ;;  %v1766_v48 = vld [vmem:[#allocation5 + $0x270] sm:$0xff]  ;;  %v1767_v49 = vld [vmem:[#allocation5 + $0x278] sm:$0xff] }
0x1464   :  { %v1768_v51 = vld [vmem:[#allocation5 + $0x280] sm:$0xff] }
0x1465   :  { %2608 = vtanh.f32 %v1560_v50  ;;  %v1905_v53 = vmul.f32 -1.442695, %v1560_v50  ;;  %v2515_v50 = vpack.c.bf16 %v1767_v49, %v1766_v48 }
0x1467   :  { %2610 = vpow2.f32 %v1905_v53 }
0x146f   :  { %v2609_v52 = vpop.eup %2608 }
0x1470   :  { %1570 = vrot.lane.b32.xlu1 %v2609_v52, %s2699_s1  ;;  %v1769_v52 = vld [vmem:[#allocation5 + $0x288] sm:$0xff] }
0x1471   :  { %v2611_v54 = vpop.eup %2610  ;;  %v2518_v53 = vpack.c.bf16 %v1769_v52, %v1768_v51 }
0x1472   :  { %v1564_v23 = vadd.f32 1.0, %v2611_v54  ;;  %v1770_v54 = vld [vmem:[#allocation5 + $0x290] sm:$0xff] }
0x1474   :  { %2612 = vrcp.f32 %v1564_v23  ;;  %v1771_v23 = vld [vmem:[#allocation5 + $0x298] sm:$0xff] }
0x147e   :  { %v2613_v55 = vpop.eup %2612 }
0x147f   :  { %v1568_v58 = vmul.f32 %v2613_v55, %v1403_v3  ;;  %v1758_v3 = vld [vmem:[#allocation5 + $0x230] sm:$0xff] }
0x1480   :  { %v2503_v40 = vpack.c.bf16 %v1759_v38, %v1758_v3 }
0x14e2   :  { %v1571_v56 = vpop.permute.xlu1 %1570 }
0x14e3   :  { %v1573_v57 = vmul.f32 %v2613_v55, %v1571_v56  ;;  %v1881_v56 = vld [vmem:[#allocation5 + $0x2b1] ss:$0 sm:$0xff] }
0x14e5   :  { %1575 = vrot.lane.b32.xlu0 %v1573_v57, %s2700_s6  ;;  %v259_v57 = vadd.f32 %v1881_v56, %v2825_v4 }
0x1557   :  { %v1576_v59 = vpop.permute.xlu0 %1575 }
0x1558   :  { %v1578_v37 = vadd.f32 %v1576_v59, %v1568_v58 }
0x155a   :  { %2614 = vtanh.f32 %v1578_v37 }
0x1564   :  { %v2615_v7 = vpop.eup %2614 }
0x1565   :  { %1581 = vrot.lane.b32.xlu1 %v2615_v7, %s2699_s1 }
0x15d7   :  { %v1582_v17 = vpop.permute.xlu1 %1581 }
0x15d8   :  { %v1584_v21 = vmul.f32 %v2613_v55, %v1582_v17  ;;  %v2521_v55 = vpack.c.bf16 %v1771_v23, %v1770_v54 }
0x15da   :  { %1590 = vrot.lane.b32.xlu0 %v1584_v21, %s2700_s6 }
0x164c   :  { %v1591_v32 = vpop.permute.xlu0 %1590 }
0x164d   :  { %v1859_v33 = vsel %vm262_vm1, %v1591_v32, %v1578_v37  ;;  %2275 = vmatmul.mubr.msk.f32.vlgmr.msra.gmra.mrb[2].mxu1 %vm262_vm1, %v1591_v32 }
0x164e   :  { %v1861_v34 = vsel %vm1860_vm3, %v1859_v33, 0.0  ;;  %2344 = vmatprep.mubr.msk.f32.mxu1 %vm2697_vm0, %v2698_v1  ;;  %2504 = vmatpush3.bf16.msra.mxu1 %v2503_v40  ;;  %v1764_v1 = vld [vmem:[#allocation5 + $0x260] sm:$0xff] }
0x164f   :  { %1863 = vst [vmem:[#allocation7 + $0x8] sm:$0xff] %v1861_v34  ;;  %2505 = vmatprep.subr.bf16.mxu1 %v2696_v0  ;;  %v2512_v47 = vpack.c.bf16 %v1765_v46, %v1764_v1 }
0x1652   :  { %2507 = vmatpush3.bf16.msra.mxu1 %v2506_v42 }
0x1653   :  { %2508 = vmatprep.subr.bf16.mxu1 %v2696_v0 }
0x1656   :  { %2510 = vmatpush3.bf16.msra.mxu1 %v2509_v45 }
0x1657   :  { %2511 = vmatprep.subr.bf16.mxu1 %v2696_v0 }
0x165a   :  { %2513 = vmatpush3.bf16.msra.mxu1 %v2512_v47 }
0x165b   :  { %2514 = vmatprep.subr.bf16.mxu1 %v2696_v0 }
0x165e   :  { %2516 = vmatpush3.bf16.msra.mxu1 %v2515_v50 }
0x165f   :  { %2517 = vmatprep.subr.bf16.mxu1 %v2696_v0 }
0x1662   :  { %2519 = vmatpush3.bf16.msra.mxu1 %v2518_v53 }
0x1663   :  { %2520 = vmatprep.subr.bf16.mxu1 %v2696_v0 }
0x1666   :  { %2522 = vmatpush3.bf16.msra.mxu1 %v2521_v55 }
0x1667   :  { %2523 = vmatprep.subr.bf16.mxu1 %v2696_v0 }
0x166a   :  { %2525 = vmatpush3.bf16.msra.mxu1 %v2524_v63 }
0x1720   :  { %v1660_v58 = vpop.f32.mrb[2].mxu1 }
0x1721   :  { %v2527_v59 = vadd.f32 %v1660_v58, %v259_v57  ;;  %v2276_v37 = vpop.f32.mrb[3].mxu1 }
0x1723   :  { %v1665_v2 = vmax.f32 %v2527_v59, 0.0 }
0x1725   :  { %2310 = vmatmul.mubr.f32.vlgmr.msra.gmra.mrb[20].mxu0 %v1665_v2 }
0x17f8   :  { %v1753_v6 = vpop.f32.mrb[20].mxu0 }
0x17f9   :  { %v1754_v7 = vadd.f32 %v1907_v5, %v1753_v6  ;;  %v2311_v8 = vpop.f32.mrb[21].mxu0 }
0x17fb   :  { %v1757_v9 = vmax.f32 %v1754_v7, 0.0 }
0x17fd   :  { %2345 = vmatmul.mubr.f32.vlgmr.msra.gmra.mrb[8].mxu1 %v1757_v9 }
0x18d0   :  { %v1845_v0 = vpop.f32.mrb[8].mxu1 }
0x18d1   :  { %v1846_v11 = vadd.f32 %v1908_v10, %v1845_v0  ;;  %v2346_v12 = vpop.f32.mrb[9].mxu1 }
0x18d3   :  { %1849 = vmax.xlane.f32.xlu1 %v1846_v11 }
0x1960   :  { %v1850_v4 = vpop.xlane.xlu1 %1849 }
0x1961   :  { %v1851_v62 = vsub.f32 %v1846_v11, %v1850_v4 }
0x1963   :  { %v1852_v13 = vmul.f32 1.442695, %v1851_v62 }
0x1965   :  { %2616 = vpow2.f32 %v1852_v13 }
0x196f   :  { %v2617_v14 = vpop.eup %2616 }
0x1970   :  { %1854 = vadd.xlane.f32.xlu0 %v2617_v14 }
0x19fd   :  { %v1855_v16 = vpop.xlane.xlu0 %1854 }
0x19fe   :  { %2618 = vrcp.f32 %v1855_v16 }
0x1a08   :  { %v2619_v17 = vpop.eup %2618 }
0x1a09   :  { %v1857_v18 = vmul.f32 %v2619_v17, %v2617_v14 }
0x1a0b   :  { %1862 = vst [vmem:[#allocation7] sm:$0xff] %v1857_v18 }
0x1a0c   :  { %2675 = shalt.err (!%p2672_p6)
}
0x1a0d   :  { %s2676_s12 = scalar_lea.hbm %s2946_s2, 256 }
0x1a0e   :  { %p2677_p7 = scmp.ne.s32.totalorder %s2946_s2, %s2676_s12  ;;  %p2680_p8 = scmp.lt.u32.totalorder %s2676_s12, %s2946_s2 }
0x1a10   :  { %p2682_p9 = pnand %p2680_p8, %p2677_p7 }
0x1a12   :  { %2685 = shalt.err (!%p2682_p9)
}
0x1a13   :  { %1873 = dma.vmem_to_hbm [thread:$0]  %s1871_s8, 256, %s2946_s2, [#allocation4]  }
0x1a14   :  { %2690 = dma.done.wait [#allocation4], 256  }
0x1a15   :  { %2691 = vsyncadd [#allocation4], 4294967040 }
0x1a16   :  { %1877 = vsyncpa [#allocation3], 1 }
0x1a17   :  { %1878 = vsyncpa [#allocation6], 1 }
0x1a18   :  { %1879 = vsyncpa [#allocation4], 1 }

</bundles_post_ra>
